<compile_context>
chip_gen: v6e
topology: v6e:2x2x1
jax: 0.10.0
libtpu: 0.0.40
codegen_flags: <defaults>
</compile_context>

<pallas_src>
import functools

import jax
import jax.numpy as jnp
from jax.experimental import pallas as pl
from jax.experimental.pallas import tpu as pltpu

# bf16 operands for every MXU matmul (native MXU dtype on v5e/v6e/v7x: half
# the operand HBM/VMEM bytes and several-x higher MXU rate); accumulation is
# always f32.  Set to jnp.float32 to reproduce PyTorch f32 matmul numerics.
MXU_DTYPE = jnp.bfloat16


def _full_spec(shape):
    return pl.BlockSpec(shape, lambda: (0,) * len(shape))


# ---------------------------------------------------------------------------
# Kernel 1: matmul + folded-BN bias + optional ReLU (stem conv, 1x1 "a" conv).
# ---------------------------------------------------------------------------

def _matmul_bias_act_kernel(a_ref, w_ref, b_ref, o_ref, *, relu):
    y = jnp.dot(a_ref[...], w_ref[...], preferred_element_type=jnp.float32)
    y = y + b_ref[...]
    if relu:
        y = jnp.maximum(y, 0.0)
    o_ref[...] = y.astype(o_ref.dtype)


def matmul_bias_act(a, w, bias, relu=True, out_dtype=jnp.float32):
    """a: [M,K], w: [K,C] (BN scale pre-folded), bias: [1,C] f32."""
    m, k = a.shape
    _, c = w.shape
    # Single grid step: these matmuls are tiny at smoke scale, and a split M
    # grid is pure per-step overhead on single-TensorCore chips (v5e/v6e).
    # TODO(synk): for the real regnet_y_3_2gf config add M/K tiling with an
    # f32 VMEM accumulator and a "parallel" M axis for v7x megacore.
    return pl.pallas_call(
        functools.partial(_matmul_bias_act_kernel, relu=relu),
        out_shape=jax.ShapeDtypeStruct((m, c), out_dtype),
        in_specs=[_full_spec((m, k)), _full_spec((k, c)), _full_spec((1, c))],
        out_specs=_full_spec((m, c)),
    )(a.astype(MXU_DTYPE), w.astype(MXU_DTYPE), bias)


# ---------------------------------------------------------------------------
# Kernel 2: fused Y-block tail.
#   grouped-3x3 matmul + BN + ReLU -> SE (pool, fc1+ReLU, fc2+sigmoid, gate)
#   -> 1x1 "c" conv + BN -> (projection conv + BN | identity) shortcut
#   -> residual add + ReLU
# One grid step per batch element (per-sample SE pooling; "parallel" for v7x).
# All intermediates stay in VMEM/vregs.
# ---------------------------------------------------------------------------

def _block_tail_kernel(*refs, has_proj):
    (p_ref, wb_ref, bb_ref, w1_ref, b1_ref, w2_ref, b2_ref,
     wc_ref, bc_ref) = refs[:9]
    if has_proj:
        xs_ref, wp_ref, bp_ref, o_ref = refs[9:]
    else:
        sc_ref, o_ref = refs[9:]

    # 3x3 grouped conv (dense block-diagonal matmul over im2col patches)
    # + folded-BN bias + ReLU.
    yb = jnp.dot(p_ref[...], wb_ref[...], preferred_element_type=jnp.float32)
    yb = jnp.maximum(yb + bb_ref[...], 0.0)                 # [OHW, Cmid] f32

    # Squeeze-Excitation, entirely in VMEM.
    pooled = jnp.mean(yb, axis=0, keepdims=True)            # [1, Cmid]
    hid = jnp.dot(pooled.astype(MXU_DTYPE), w1_ref[...],
                  preferred_element_type=jnp.float32) + b1_ref[...]
    hid = jnp.maximum(hid, 0.0)
    z = jnp.dot(hid.astype(MXU_DTYPE), w2_ref[...],
                preferred_element_type=jnp.float32) + b2_ref[...]
    gate = 1.0 / (1.0 + jnp.exp(-z))                        # exact sigmoid

    # Channel gate fused straight into the c-conv input (no HBM roundtrip).
    ybs = (yb * gate).astype(MXU_DTYPE)                     # [OHW, Cmid]

    # c: 1x1 conv + folded-BN bias.
    yc = jnp.dot(ybs, wc_ref[...],
                 preferred_element_type=jnp.float32) + bc_ref[...]

    # Shortcut: 1x1 projection conv + BN, or identity; residual add + ReLU.
    if has_proj:
        sc = jnp.dot(xs_ref[...], wp_ref[...],
                     preferred_element_type=jnp.float32) + bp_ref[...]
    else:
        sc = sc_ref[...]
    o_ref[...] = jnp.maximum(yc + sc, 0.0)


def fused_block_tail(patches, wb, bb, w1, b1, w2, b2, wc, bc,
                     shortcut_args, has_proj, n, ohw):
    kb = patches.shape[1]
    cmid = wb.shape[1]
    cout = wc.shape[1]
    s_ch = w1.shape[1]

    in_specs = [
        pl.BlockSpec((ohw, kb), lambda i: (i, 0)),       # per-sample patches
        pl.BlockSpec((kb, cmid), lambda i: (0, 0)),
        pl.BlockSpec((1, cmid), lambda i: (0, 0)),
        pl.BlockSpec((cmid, s_ch), lambda i: (0, 0)),
        pl.BlockSpec((1, s_ch), lambda i: (0, 0)),
        pl.BlockSpec((s_ch, cmid), lambda i: (0, 0)),
        pl.BlockSpec((1, cmid), lambda i: (0, 0)),
        pl.BlockSpec((cmid, cout), lambda i: (0, 0)),
        pl.BlockSpec((1, cout), lambda i: (0, 0)),
    ]
    if has_proj:
        xs, _, _ = shortcut_args
        cin = xs.shape[1]
        in_specs += [pl.BlockSpec((ohw, cin), lambda i: (i, 0)),
                     pl.BlockSpec((cin, cout), lambda i: (0, 0)),
                     pl.BlockSpec((1, cout), lambda i: (0, 0))]
    else:
        in_specs += [pl.BlockSpec((ohw, cout), lambda i: (i, 0))]

    return pl.pallas_call(
        functools.partial(_block_tail_kernel, has_proj=has_proj),
        out_shape=jax.ShapeDtypeStruct((n * ohw, cout), jnp.float32),
        grid=(n,),
        in_specs=in_specs,
        out_specs=pl.BlockSpec((ohw, cout), lambda i: (i, 0)),
        compiler_params=pltpu.CompilerParams(dimension_semantics=("parallel",)),
    )(patches, wb, bb, w1, b1, w2, b2, wc, bc, *shortcut_args)


# ---------------------------------------------------------------------------
# Kernel 3: head  (AdaptiveAvgPool2d(1) + flatten + AdaptiveAvgPool1d(1)).
# Spatial (sublane/VPU) mean first, then channel (lane/XLU) mean.
# ---------------------------------------------------------------------------

def _head_kernel(x_ref, o_ref):
    s = jnp.mean(x_ref[...], axis=1)                     # [N, C]
    o_ref[...] = jnp.mean(s, axis=-1, keepdims=True)     # [N, 1]


def head_pool(x):
    n, h, w, c = x.shape
    xf = x.reshape(n, h * w, c)
    out = pl.pallas_call(
        _head_kernel,
        out_shape=jax.ShapeDtypeStruct((n, 1), jnp.float32),
        in_specs=[_full_spec((n, h * w, c))],
        out_specs=_full_spec((n, 1)),
    )(xf)
    return out.reshape(n)


# ---------------------------------------------------------------------------
# Model glue (layout handling, im2col, parameter folding).
# ---------------------------------------------------------------------------

def _bn_fold(bn, eps=1e-5):
    scale = bn["gamma"] / jnp.sqrt(bn["var"] + eps)
    bias = bn["beta"] - bn["mean"] * scale
    return scale, bias


def _fold_conv_bn(w2d, bn):
    """Fold BN scale into a [K,Cout] weight (cast to MXU dtype); f32 bias row."""
    scale, bias = _bn_fold(bn)
    return (w2d * scale[None, :]).astype(MXU_DTYPE), bias[None, :]


def _im2col(x, kh, kw, stride, padding):
    """XLA-side patch extraction (negligible at smoke scale).
    TODO(synk): at the real 224^2 regnet_y_3_2gf config move this in-kernel
    (per-tap accumulation over a kh*kw grid axis) to avoid the kh*kw x HBM
    read amplification of materialized patches."""
    n, h, w, cin = x.shape
    oh = (h + 2 * padding - kh) // stride + 1
    ow = (w + 2 * padding - kw) // stride + 1
    xp = jnp.pad(x, ((0, 0), (padding, padding), (padding, padding), (0, 0)))
    cols = [xp[:, i:i + stride * oh:stride, j:j + stride * ow:stride, :]
            for i in range(kh) for j in range(kw)]
    patches = jnp.concatenate(cols, axis=-1).reshape(n * oh * ow, kh * kw * cin)
    return patches, oh, ow


def _expand_group_weight(w, groups):
    """[KH,KW,Cin/g,Cout] grouped weight -> dense block-diagonal [KH,KW,Cin,Cout].
    Exact; lets the grouped conv run as ONE dense MXU matmul with large K.
    TODO(synk): for the real regnet_y_3_2gf config (groups up to 63, dense
    weight ~82 MB, exceeds v7x VMEM) switch to a per-group grid axis + K tiling."""
    kh, kw, cg, cout = w.shape
    cin = cg * groups
    cgo = cout // groups
    wd = jnp.zeros((kh, kw, cin, cout), w.dtype)
    for g in range(groups):
        wd = wd.at[:, :, g * cg:(g + 1) * cg, g * cgo:(g + 1) * cgo].set(
            w[..., g * cgo:(g + 1) * cgo])
    return wd


def stem(x, w, bn):
    n = x.shape[0]
    kh, kw, cin, cout = w.shape
    patches, oh, ow = _im2col(x, kh, kw, stride=2, padding=1)
    wm, bias = _fold_conv_bn(w.reshape(kh * kw * cin, cout), bn)
    y = matmul_bias_act(patches, wm, bias, relu=True)
    return y.reshape(n, oh, ow, cout)


def y_block(x, p):
    """torchvision ResBottleneckBlock(Y) as two fused Pallas kernels."""
    n, h, w, cin = x.shape
    stride = p["stride"]

    # a: 1x1 conv + BN + ReLU.  Output in MXU_DTYPE (it only feeds the b-conv
    # patches), halving the im2col HBM traffic.
    wa, ba = _fold_conv_bn(p["a_w"].reshape(cin, -1), p["a_bn"])
    cmid = wa.shape[1]
    hmid = matmul_bias_act(x.reshape(n * h * w, cin), wa, ba, relu=True,
                           out_dtype=MXU_DTYPE).reshape(n, h, w, cmid)

    # b: 3x3 grouped conv patches (wrapper-side im2col; stride handled here).
    wb4 = _expand_group_weight(p["b_w"], p["groups"])
    patches, oh, ow = _im2col(hmid, 3, 3, stride, 1)
    wb, bb = _fold_conv_bn(wb4.reshape(9 * cmid, cmid), p["b_bn"])

    # SE weights.
    se = p["se"]
    w1 = se["w1"].astype(MXU_DTYPE)
    b1 = se["b1"][None, :]
    w2 = se["w2"].astype(MXU_DTYPE)
    b2 = se["b2"][None, :]

    # c: 1x1 conv + BN.
    wc, bc = _fold_conv_bn(p["c_w"].reshape(cmid, -1), p["c_bn"])
    cout = wc.shape[1]

    ohw = oh * ow
    if p["proj_w"] is not None:
        xs = x[:, ::stride, ::stride, :].reshape(n * ohw, cin).astype(MXU_DTYPE)
        wp, bp = _fold_conv_bn(p["proj_w"].reshape(cin, -1), p["proj_bn"])
        shortcut_args, has_proj = [xs, wp, bp], True
    else:
        shortcut_args, has_proj = [x.reshape(n * ohw, cout)], False

    out = fused_block_tail(patches, wb, bb, w1, b1, w2, b2, wc, bc,
                           shortcut_args, has_proj, n, ohw)
    return out.reshape(n, oh, ow, cout)


def rccnet_forward(x_nchw, params):
    # PyTorch NCHW input -> NHWC internal layout.
    x = jnp.transpose(x_nchw, (0, 2, 3, 1)).astype(jnp.float32)
    x = stem(x, params["stem_w"], params["stem_bn"])     # backbone.stem
    for blk in params["blocks"]:                         # backbone.trunk_output
        x = y_block(x, blk)
    # avgpool + flatten + AdaptiveAvgPool1d(1) + squeeze_ -> [N]
    return head_pool(x)


# ---------------------------------------------------------------------------
# Deterministic parameter construction (scaled-down RegNet-Y-style backbone).
# ---------------------------------------------------------------------------

STEM_WIDTH = 16
STAGES = [(24, 2, 8, 1), (32, 2, 8, 1)]   # (width_out, stride, group_width, depth)
SE_RATIO = 0.25
# TODO(synk): the real regnet_y_3_2gf config (stem 32, widths [72,216,576,1512],
# depths [2,5,13,1], group width 24) runs through the same code path but is too
# large for this smoke test; pretrained torchvision weights are not loaded.


def init_params(key):
    keys = iter(jax.random.split(key, 128))

    def conv_w(kh, kw, cin, cout):
        fan_in = kh * kw * cin
        return jax.random.normal(next(keys), (kh, kw, cin, cout), jnp.float32) / jnp.sqrt(fan_in)

    def fc_w(cin, cout):
        return jax.random.normal(next(keys), (cin, cout), jnp.float32) / jnp.sqrt(cin)

    def bn(c):
        return {
            "gamma": 1.0 + 0.1 * jax.random.normal(next(keys), (c,), jnp.float32),
            "beta": 0.1 * jax.random.normal(next(keys), (c,), jnp.float32),
            "mean": 0.1 * jax.random.normal(next(keys), (c,), jnp.float32),
            "var": 1.0 + 0.1 * jnp.abs(jax.random.normal(next(keys), (c,), jnp.float32)),
        }

    params = {"stem_w": conv_w(3, 3, 3, STEM_WIDTH), "stem_bn": bn(STEM_WIDTH), "blocks": []}
    w_in = STEM_WIDTH
    for (w_out, stride, gw, depth) in STAGES:
        for d in range(depth):
            s = stride if d == 0 else 1
            groups = w_out // gw
            se_ch = max(1, int(round(SE_RATIO * w_in)))
            blk = {
                "stride": s,
                "groups": groups,
                "a_w": conv_w(1, 1, w_in, w_out), "a_bn": bn(w_out),
                "b_w": conv_w(3, 3, gw, w_out), "b_bn": bn(w_out),
                "se": {
                    "w1": fc_w(w_out, se_ch),
                    "b1": 0.01 * jax.random.normal(next(keys), (se_ch,), jnp.float32),
                    "w2": fc_w(se_ch, w_out),
                    "b2": 0.01 * jax.random.normal(next(keys), (w_out,), jnp.float32),
                },
                "c_w": conv_w(1, 1, w_out, w_out), "c_bn": bn(w_out),
            }
            if w_in != w_out or s != 1:
                blk["proj_w"] = conv_w(1, 1, w_in, w_out)
                blk["proj_bn"] = bn(w_out)
            else:
                blk["proj_w"] = None
                blk["proj_bn"] = None
            params["blocks"].append(blk)
            w_in = w_out
    return params


if __name__ == "__main__":
    key = jax.random.PRNGKey(0)
    pkey, xkey = jax.random.split(key)
    params = init_params(pkey)
    # Small input consistent with the module's [N, 3, H, W] float32 contract.
    x = jax.random.uniform(xkey, (2, 3, 32, 32), dtype=jnp.float32)
    fwd = jax.jit(lambda inp: rccnet_forward(inp, params))
    out = jax.block_until_ready(fwd(x))
    assert out.shape == (2,) and out.dtype == jnp.float32
    print("KERNEL_OK")
</pallas_src>

<mosaic_0001>
module attributes {stable_mosaic.version = 11 : i64} {
  func.func @_matmul_bias_act_kernel(%arg0: memref<512x27xbf16, #tpu.memory_space<vmem>>, %arg1: memref<27x16xbf16, #tpu.memory_space<vmem>>, %arg2: memref<1x16xf32, #tpu.memory_space<vmem>>, %arg3: memref<512x16xf32, #tpu.memory_space<vmem>>) attributes {dimension_semantics = [], scalar_prefetch = 0 : i64, scratch_operands = 0 : i64, tpu.core_type = #tpu.core_type<tc>} {
    %c0 = arith.constant 0 : index
    %c0_0 = arith.constant 0 : index
    %0 = vector.load %arg0[%c0, %c0_0] : memref<512x27xbf16, #tpu.memory_space<vmem>>, vector<512x27xbf16>
    %c0_1 = arith.constant 0 : index
    %c0_2 = arith.constant 0 : index
    %1 = vector.load %arg1[%c0_1, %c0_2] : memref<27x16xbf16, #tpu.memory_space<vmem>>, vector<27x16xbf16>
    %cst = arith.constant dense<0.000000e+00> : vector<512x16xf32>
    %2 = tpu.matmul %0, %1, %cst {dimension_numbers = #tpu.dot_dimension_numbers<[1], [0], [0], [1], [0, 0, 1, 1], [], []>} : vector<512x27xbf16>, vector<27x16xbf16>, vector<512x16xf32> -> vector<512x16xf32>
    %c0_3 = arith.constant 0 : index
    %c0_4 = arith.constant 0 : index
    %3 = vector.load %arg2[%c0_3, %c0_4] : memref<1x16xf32, #tpu.memory_space<vmem>>, vector<1x16xf32>
    %4 = vector.broadcast %3 : vector<1x16xf32> to vector<512x16xf32>
    %5 = arith.addf %2, %4 : vector<512x16xf32>
    %cst_5 = arith.constant 0.000000e+00 : f32
    %6 = vector.broadcast %cst_5 : f32 to vector<512x16xf32>
    %7 = arith.maximumf %5, %6 : vector<512x16xf32>
    %c0_6 = arith.constant 0 : index
    %c0_7 = arith.constant 0 : index
    %8 = vector.load %arg3[%c0_6, %c0_7] : memref<512x16xf32, #tpu.memory_space<vmem>>, vector<512x16xf32>
    tpu.vector_store %arg3[%c0_6, %c0_7], %7 {strides = array<i32>} : memref<512x16xf32, #tpu.memory_space<vmem>>, vector<512x16xf32>,
    return
  }
}

module attributes {stable_mosaic.version = 11 : i64} {
  func.func @_matmul_bias_act_kernel(%arg0: memref<512x16xbf16, #tpu.memory_space<vmem>>, %arg1: memref<16x24xbf16, #tpu.memory_space<vmem>>, %arg2: memref<1x24xf32, #tpu.memory_space<vmem>>, %arg3: memref<512x24xbf16, #tpu.memory_space<vmem>>) attributes {dimension_semantics = [], scalar_prefetch = 0 : i64, scratch_operands = 0 : i64, tpu.core_type = #tpu.core_type<tc>} {
    %c0 = arith.constant 0 : index
    %c0_0 = arith.constant 0 : index
    %0 = vector.load %arg0[%c0, %c0_0] : memref<512x16xbf16, #tpu.memory_space<vmem>>, vector<512x16xbf16>
    %c0_1 = arith.constant 0 : index
    %c0_2 = arith.constant 0 : index
    %1 = vector.load %arg1[%c0_1, %c0_2] : memref<16x24xbf16, #tpu.memory_space<vmem>>, vector<16x24xbf16>
    %cst = arith.constant dense<0.000000e+00> : vector<512x24xf32>
    %2 = tpu.matmul %0, %1, %cst {dimension_numbers = #tpu.dot_dimension_numbers<[1], [0], [0], [1], [0, 0, 1, 1], [], []>} : vector<512x16xbf16>, vector<16x24xbf16>, vector<512x24xf32> -> vector<512x24xf32>
    %c0_3 = arith.constant 0 : index
    %c0_4 = arith.constant 0 : index
    %3 = vector.load %arg2[%c0_3, %c0_4] : memref<1x24xf32, #tpu.memory_space<vmem>>, vector<1x24xf32>
    %4 = vector.broadcast %3 : vector<1x24xf32> to vector<512x24xf32>
    %5 = arith.addf %2, %4 : vector<512x24xf32>
    %cst_5 = arith.constant 0.000000e+00 : f32
    %6 = vector.broadcast %cst_5 : f32 to vector<512x24xf32>
    %7 = arith.maximumf %5, %6 : vector<512x24xf32>
    %8 = arith.truncf %7 : vector<512x24xf32> to vector<512x24xbf16>
    %c0_6 = arith.constant 0 : index
    %c0_7 = arith.constant 0 : index
    %9 = vector.load %arg3[%c0_6, %c0_7] : memref<512x24xbf16, #tpu.memory_space<vmem>>, vector<512x24xbf16>
    tpu.vector_store %arg3[%c0_6, %c0_7], %8 {strides = array<i32>} : memref<512x24xbf16, #tpu.memory_space<vmem>>, vector<512x24xbf16>,
    return
  }
}

module attributes {stable_mosaic.version = 11 : i64} {
  func.func @_matmul_bias_act_kernel(%arg0: memref<128x24xbf16, #tpu.memory_space<vmem>>, %arg1: memref<24x32xbf16, #tpu.memory_space<vmem>>, %arg2: memref<1x32xf32, #tpu.memory_space<vmem>>, %arg3: memref<128x32xbf16, #tpu.memory_space<vmem>>) attributes {dimension_semantics = [], scalar_prefetch = 0 : i64, scratch_operands = 0 : i64, tpu.core_type = #tpu.core_type<tc>} {
    %c0 = arith.constant 0 : index
    %c0_0 = arith.constant 0 : index
    %0 = vector.load %arg0[%c0, %c0_0] : memref<128x24xbf16, #tpu.memory_space<vmem>>, vector<128x24xbf16>
    %c0_1 = arith.constant 0 : index
    %c0_2 = arith.constant 0 : index
    %1 = vector.load %arg1[%c0_1, %c0_2] : memref<24x32xbf16, #tpu.memory_space<vmem>>, vector<24x32xbf16>
    %cst = arith.constant dense<0.000000e+00> : vector<128x32xf32>
    %2 = tpu.matmul %0, %1, %cst {dimension_numbers = #tpu.dot_dimension_numbers<[1], [0], [0], [1], [0, 0, 1, 1], [], []>} : vector<128x24xbf16>, vector<24x32xbf16>, vector<128x32xf32> -> vector<128x32xf32>
    %c0_3 = arith.constant 0 : index
    %c0_4 = arith.constant 0 : index
    %3 = vector.load %arg2[%c0_3, %c0_4] : memref<1x32xf32, #tpu.memory_space<vmem>>, vector<1x32xf32>
    %4 = vector.broadcast %3 : vector<1x32xf32> to vector<128x32xf32>
    %5 = arith.addf %2, %4 : vector<128x32xf32>
    %cst_5 = arith.constant 0.000000e+00 : f32
    %6 = vector.broadcast %cst_5 : f32 to vector<128x32xf32>
    %7 = arith.maximumf %5, %6 : vector<128x32xf32>
    %8 = arith.truncf %7 : vector<128x32xf32> to vector<128x32xbf16>
    %c0_6 = arith.constant 0 : index
    %c0_7 = arith.constant 0 : index
    %9 = vector.load %arg3[%c0_6, %c0_7] : memref<128x32xbf16, #tpu.memory_space<vmem>>, vector<128x32xbf16>
    tpu.vector_store %arg3[%c0_6, %c0_7], %8 {strides = array<i32>} : memref<128x32xbf16, #tpu.memory_space<vmem>>, vector<128x32xbf16>,
    return
  }
}

module attributes {stable_mosaic.version = 11 : i64} {
  func.func @_block_tail_kernel(%arg0: i32, %arg1: memref<64x216xbf16, #tpu.memory_space<vmem>>, %arg2: memref<216x24xbf16, #tpu.memory_space<vmem>>, %arg3: memref<1x24xf32, #tpu.memory_space<vmem>>, %arg4: memref<24x4xbf16, #tpu.memory_space<vmem>>, %arg5: memref<1x4xf32, #tpu.memory_space<vmem>>, %arg6: memref<4x24xbf16, #tpu.memory_space<vmem>>, %arg7: memref<1x24xf32, #tpu.memory_space<vmem>>, %arg8: memref<24x24xbf16, #tpu.memory_space<vmem>>, %arg9: memref<1x24xf32, #tpu.memory_space<vmem>>, %arg10: memref<64x16xbf16, #tpu.memory_space<vmem>>, %arg11: memref<16x24xbf16, #tpu.memory_space<vmem>>, %arg12: memref<1x24xf32, #tpu.memory_space<vmem>>, %arg13: memref<64x24xf32, #tpu.memory_space<vmem>>) attributes {dimension_semantics = [#tpu.dimension_semantics<parallel>], iteration_bounds = array<i64: 2>, scalar_prefetch = 0 : i64, scratch_operands = 0 : i64, tpu.core_type = #tpu.core_type<tc>, window_params = [{transform_indices = @transform_0, window_bounds = array<i64: 64, 216>}, {pipeline_mode = #tpu.pipeline_mode<synchronous>, transform_indices = @transform_1, window_bounds = array<i64: 216, 24>}, {pipeline_mode = #tpu.pipeline_mode<synchronous>, transform_indices = @transform_2, window_bounds = array<i64: 1, 24>}, {pipeline_mode = #tpu.pipeline_mode<synchronous>, transform_indices = @transform_3, window_bounds = array<i64: 24, 4>}, {pipeline_mode = #tpu.pipeline_mode<synchronous>, transform_indices = @transform_4, window_bounds = array<i64: 1, 4>}, {pipeline_mode = #tpu.pipeline_mode<synchronous>, transform_indices = @transform_5, window_bounds = array<i64: 4, 24>}, {pipeline_mode = #tpu.pipeline_mode<synchronous>, transform_indices = @transform_6, window_bounds = array<i64: 1, 24>}, {pipeline_mode = #tpu.pipeline_mode<synchronous>, transform_indices = @transform_7, window_bounds = array<i64: 24, 24>}, {pipeline_mode = #tpu.pipeline_mode<synchronous>, transform_indices = @transform_8, window_bounds = array<i64: 1, 24>}, {transform_indices = @transform_9, window_bounds = array<i64: 64, 16>}, {pipeline_mode = #tpu.pipeline_mode<synchronous>, transform_indices = @transform_10, window_bounds = array<i64: 16, 24>}, {pipeline_mode = #tpu.pipeline_mode<synchronous>, transform_indices = @transform_11, window_bounds = array<i64: 1, 24>}, {transform_indices = @transform_12, window_bounds = array<i64: 64, 24>}]} {
    %c0 = arith.constant 0 : index
    %c0_0 = arith.constant 0 : index
    %0 = vector.load %arg1[%c0, %c0_0] : memref<64x216xbf16, #tpu.memory_space<vmem>>, vector<64x216xbf16>
    %c0_1 = arith.constant 0 : index
    %c0_2 = arith.constant 0 : index
    %1 = vector.load %arg2[%c0_1, %c0_2] : memref<216x24xbf16, #tpu.memory_space<vmem>>, vector<216x24xbf16>
    %cst = arith.constant dense<0.000000e+00> : vector<64x24xf32>
    %2 = tpu.matmul %0, %1, %cst {dimension_numbers = #tpu.dot_dimension_numbers<[1], [0], [0], [1], [0, 0, 1, 1], [], []>} : vector<64x216xbf16>, vector<216x24xbf16>, vector<64x24xf32> -> vector<64x24xf32>
    %c0_3 = arith.constant 0 : index
    %c0_4 = arith.constant 0 : index
    %3 = vector.load %arg3[%c0_3, %c0_4] : memref<1x24xf32, #tpu.memory_space<vmem>>, vector<1x24xf32>
    %4 = vector.broadcast %3 : vector<1x24xf32> to vector<64x24xf32>
    %5 = arith.addf %2, %4 : vector<64x24xf32>
    %cst_5 = arith.constant 0.000000e+00 : f32
    %6 = vector.broadcast %cst_5 : f32 to vector<64x24xf32>
    %7 = arith.maximumf %5, %6 : vector<64x24xf32>
    %cst_6 = arith.constant dense<0.000000e+00> : vector<24xf32>
    %8 = vector.multi_reduction <add>, %7, %cst_6 [0] : vector<64x24xf32> to vector<24xf32>
    %9 = vector.shape_cast %8 : vector<24xf32> to vector<1x24xf32>
    %cst_7 = arith.constant 6.400000e+01 : f32
    %10 = vector.broadcast %cst_7 : f32 to vector<1x24xf32>
    %11 = arith.divf %9, %10 : vector<1x24xf32>
    %12 = arith.truncf %11 : vector<1x24xf32> to vector<1x24xbf16>
    %c0_8 = arith.constant 0 : index
    %c0_9 = arith.constant 0 : index
    %13 = vector.load %arg4[%c0_8, %c0_9] : memref<24x4xbf16, #tpu.memory_space<vmem>>, vector<24x4xbf16>
    %cst_10 = arith.constant dense<0.000000e+00> : vector<1x4xf32>
    %14 = tpu.matmul %12, %13, %cst_10 {dimension_numbers = #tpu.dot_dimension_numbers<[1], [0], [0], [1], [0, 0, 1, 1], [], []>} : vector<1x24xbf16>, vector<24x4xbf16>, vector<1x4xf32> -> vector<1x4xf32>
    %c0_11 = arith.constant 0 : index
    %c0_12 = arith.constant 0 : index
    %15 = vector.load %arg5[%c0_11, %c0_12] : memref<1x4xf32, #tpu.memory_space<vmem>>, vector<1x4xf32>
    %16 = arith.addf %14, %15 : vector<1x4xf32>
    %cst_13 = arith.constant 0.000000e+00 : f32
    %17 = vector.broadcast %cst_13 : f32 to vector<1x4xf32>
    %18 = arith.maximumf %16, %17 : vector<1x4xf32>
    %19 = arith.truncf %18 : vector<1x4xf32> to vector<1x4xbf16>
    %c0_14 = arith.constant 0 : index
    %c0_15 = arith.constant 0 : index
    %20 = vector.load %arg6[%c0_14, %c0_15] : memref<4x24xbf16, #tpu.memory_space<vmem>>, vector<4x24xbf16>
    %cst_16 = arith.constant dense<0.000000e+00> : vector<1x24xf32>
    %21 = tpu.matmul %19, %20, %cst_16 {dimension_numbers = #tpu.dot_dimension_numbers<[1], [0], [0], [1], [0, 0, 1, 1], [], []>} : vector<1x4xbf16>, vector<4x24xbf16>, vector<1x24xf32> -> vector<1x24xf32>
    %c0_17 = arith.constant 0 : index
    %c0_18 = arith.constant 0 : index
    %22 = vector.load %arg7[%c0_17, %c0_18] : memref<1x24xf32, #tpu.memory_space<vmem>>, vector<1x24xf32>
    %23 = arith.addf %21, %22 : vector<1x24xf32>
    %cst_19 = arith.constant 0.000000e+00 : f32
    %24 = vector.broadcast %cst_19 : f32 to vector<1x24xf32>
    %25 = arith.subf %24, %23 : vector<1x24xf32>
    %26 = math.exp %25 : vector<1x24xf32>
    %cst_20 = arith.constant 1.000000e+00 : f32
    %27 = vector.broadcast %cst_20 : f32 to vector<1x24xf32>
    %28 = arith.addf %27, %26 : vector<1x24xf32>
    %cst_21 = arith.constant 1.000000e+00 : f32
    %29 = vector.broadcast %cst_21 : f32 to vector<1x24xf32>
    %30 = arith.divf %29, %28 : vector<1x24xf32>
    %31 = vector.broadcast %30 : vector<1x24xf32> to vector<64x24xf32>
    %32 = arith.mulf %7, %31 : vector<64x24xf32>
    %33 = arith.truncf %32 : vector<64x24xf32> to vector<64x24xbf16>
    %c0_22 = arith.constant 0 : index
    %c0_23 = arith.constant 0 : index
    %34 = vector.load %arg8[%c0_22, %c0_23] : memref<24x24xbf16, #tpu.memory_space<vmem>>, vector<24x24xbf16>
    %cst_24 = arith.constant dense<0.000000e+00> : vector<64x24xf32>
    %35 = tpu.matmul %33, %34, %cst_24 {dimension_numbers = #tpu.dot_dimension_numbers<[1], [0], [0], [1], [0, 0, 1, 1], [], []>} : vector<64x24xbf16>, vector<24x24xbf16>, vector<64x24xf32> -> vector<64x24xf32>
    %c0_25 = arith.constant 0 : index
    %c0_26 = arith.constant 0 : index
    %36 = vector.load %arg9[%c0_25, %c0_26] : memref<1x24xf32, #tpu.memory_space<vmem>>, vector<1x24xf32>
    %37 = vector.broadcast %36 : vector<1x24xf32> to vector<64x24xf32>
    %38 = arith.addf %35, %37 : vector<64x24xf32>
    %c0_27 = arith.constant 0 : index
    %c0_28 = arith.constant 0 : index
    %39 = vector.load %arg10[%c0_27, %c0_28] : memref<64x16xbf16, #tpu.memory_space<vmem>>, vector<64x16xbf16>
    %c0_29 = arith.constant 0 : index
    %c0_30 = arith.constant 0 : index
    %40 = vector.load %arg11[%c0_29, %c0_30] : memref<16x24xbf16, #tpu.memory_space<vmem>>, vector<16x24xbf16>
    %cst_31 = arith.constant dense<0.000000e+00> : vector<64x24xf32>
    %41 = tpu.matmul %39, %40, %cst_31 {dimension_numbers = #tpu.dot_dimension_numbers<[1], [0], [0], [1], [0, 0, 1, 1], [], []>} : vector<64x16xbf16>, vector<16x24xbf16>, vector<64x24xf32> -> vector<64x24xf32>
    %c0_32 = arith.constant 0 : index
    %c0_33 = arith.constant 0 : index
    %42 = vector.load %arg12[%c0_32, %c0_33] : memref<1x24xf32, #tpu.memory_space<vmem>>, vector<1x24xf32>
    %43 = vector.broadcast %42 : vector<1x24xf32> to vector<64x24xf32>
    %44 = arith.addf %41, %43 : vector<64x24xf32>
    %45 = arith.addf %38, %44 : vector<64x24xf32>
    %cst_34 = arith.constant 0.000000e+00 : f32
    %46 = vector.broadcast %cst_34 : f32 to vector<64x24xf32>
    %47 = arith.maximumf %45, %46 : vector<64x24xf32>
    %c0_35 = arith.constant 0 : index
    %c0_36 = arith.constant 0 : index
    %48 = vector.load %arg13[%c0_35, %c0_36] : memref<64x24xf32, #tpu.memory_space<vmem>>, vector<64x24xf32>
    tpu.vector_store %arg13[%c0_35, %c0_36], %47 {strides = array<i32>} : memref<64x24xf32, #tpu.memory_space<vmem>>, vector<64x24xf32>,
    return
  }
  func.func @transform_0(%arg0: i32) -> (i32, i32) {
    %c0_i32 = arith.constant 0 : i32
    %c0_i32_0 = arith.constant 0 : i32
    return %arg0, %c0_i32 : i32, i32
  }
  func.func @transform_1(%arg0: i32) -> (i32, i32) {
    %c0_i32 = arith.constant 0 : i32
    %c0_i32_0 = arith.constant 0 : i32
    %c0_i32_1 = arith.constant 0 : i32
    return %c0_i32, %c0_i32_0 : i32, i32
  }
  func.func @transform_2(%arg0: i32) -> (i32, i32) {
    %c0_i32 = arith.constant 0 : i32
    %c0_i32_0 = arith.constant 0 : i32
    %c0_i32_1 = arith.constant 0 : i32
    return %c0_i32, %c0_i32_0 : i32, i32
  }
  func.func @transform_3(%arg0: i32) -> (i32, i32) {
    %c0_i32 = arith.constant 0 : i32
    %c0_i32_0 = arith.constant 0 : i32
    %c0_i32_1 = arith.constant 0 : i32
    return %c0_i32, %c0_i32_0 : i32, i32
  }
  func.func @transform_4(%arg0: i32) -> (i32, i32) {
    %c0_i32 = arith.constant 0 : i32
    %c0_i32_0 = arith.constant 0 : i32
    %c0_i32_1 = arith.constant 0 : i32
    return %c0_i32, %c0_i32_0 : i32, i32
  }
  func.func @transform_5(%arg0: i32) -> (i32, i32) {
    %c0_i32 = arith.constant 0 : i32
    %c0_i32_0 = arith.constant 0 : i32
    %c0_i32_1 = arith.constant 0 : i32
    return %c0_i32, %c0_i32_0 : i32, i32
  }
  func.func @transform_6(%arg0: i32) -> (i32, i32) {
    %c0_i32 = arith.constant 0 : i32
    %c0_i32_0 = arith.constant 0 : i32
    %c0_i32_1 = arith.constant 0 : i32
    return %c0_i32, %c0_i32_0 : i32, i32
  }
  func.func @transform_7(%arg0: i32) -> (i32, i32) {
    %c0_i32 = arith.constant 0 : i32
    %c0_i32_0 = arith.constant 0 : i32
    %c0_i32_1 = arith.constant 0 : i32
    return %c0_i32, %c0_i32_0 : i32, i32
  }
  func.func @transform_8(%arg0: i32) -> (i32, i32) {
    %c0_i32 = arith.constant 0 : i32
    %c0_i32_0 = arith.constant 0 : i32
    %c0_i32_1 = arith.constant 0 : i32
    return %c0_i32, %c0_i32_0 : i32, i32
  }
  func.func @transform_9(%arg0: i32) -> (i32, i32) {
    %c0_i32 = arith.constant 0 : i32
    %c0_i32_0 = arith.constant 0 : i32
    return %arg0, %c0_i32 : i32, i32
  }
  func.func @transform_10(%arg0: i32) -> (i32, i32) {
    %c0_i32 = arith.constant 0 : i32
    %c0_i32_0 = arith.constant 0 : i32
    %c0_i32_1 = arith.constant 0 : i32
    return %c0_i32, %c0_i32_0 : i32, i32
  }
  func.func @transform_11(%arg0: i32) -> (i32, i32) {
    %c0_i32 = arith.constant 0 : i32
    %c0_i32_0 = arith.constant 0 : i32
    %c0_i32_1 = arith.constant 0 : i32
    return %c0_i32, %c0_i32_0 : i32, i32
  }
  func.func @transform_12(%arg0: i32) -> (i32, i32) {
    %c0_i32 = arith.constant 0 : i32
    %c0_i32_0 = arith.constant 0 : i32
    return %arg0, %c0_i32 : i32, i32
  }
}

module attributes {stable_mosaic.version = 11 : i64} {
  func.func @_block_tail_kernel(%arg0: i32, %arg1: memref<16x288xbf16, #tpu.memory_space<vmem>>, %arg2: memref<288x32xbf16, #tpu.memory_space<vmem>>, %arg3: memref<1x32xf32, #tpu.memory_space<vmem>>, %arg4: memref<32x6xbf16, #tpu.memory_space<vmem>>, %arg5: memref<1x6xf32, #tpu.memory_space<vmem>>, %arg6: memref<6x32xbf16, #tpu.memory_space<vmem>>, %arg7: memref<1x32xf32, #tpu.memory_space<vmem>>, %arg8: memref<32x32xbf16, #tpu.memory_space<vmem>>, %arg9: memref<1x32xf32, #tpu.memory_space<vmem>>, %arg10: memref<16x24xbf16, #tpu.memory_space<vmem>>, %arg11: memref<24x32xbf16, #tpu.memory_space<vmem>>, %arg12: memref<1x32xf32, #tpu.memory_space<vmem>>, %arg13: memref<16x32xf32, #tpu.memory_space<vmem>>) attributes {dimension_semantics = [#tpu.dimension_semantics<parallel>], iteration_bounds = array<i64: 2>, scalar_prefetch = 0 : i64, scratch_operands = 0 : i64, tpu.core_type = #tpu.core_type<tc>, window_params = [{transform_indices = @transform_0, window_bounds = array<i64: 16, 288>}, {pipeline_mode = #tpu.pipeline_mode<synchronous>, transform_indices = @transform_1, window_bounds = array<i64: 288, 32>}, {pipeline_mode = #tpu.pipeline_mode<synchronous>, transform_indices = @transform_2, window_bounds = array<i64: 1, 32>}, {pipeline_mode = #tpu.pipeline_mode<synchronous>, transform_indices = @transform_3, window_bounds = array<i64: 32, 6>}, {pipeline_mode = #tpu.pipeline_mode<synchronous>, transform_indices = @transform_4, window_bounds = array<i64: 1, 6>}, {pipeline_mode = #tpu.pipeline_mode<synchronous>, transform_indices = @transform_5, window_bounds = array<i64: 6, 32>}, {pipeline_mode = #tpu.pipeline_mode<synchronous>, transform_indices = @transform_6, window_bounds = array<i64: 1, 32>}, {pipeline_mode = #tpu.pipeline_mode<synchronous>, transform_indices = @transform_7, window_bounds = array<i64: 32, 32>}, {pipeline_mode = #tpu.pipeline_mode<synchronous>, transform_indices = @transform_8, window_bounds = array<i64: 1, 32>}, {transform_indices = @transform_9, window_bounds = array<i64: 16, 24>}, {pipeline_mode = #tpu.pipeline_mode<synchronous>, transform_indices = @transform_10, window_bounds = array<i64: 24, 32>}, {pipeline_mode = #tpu.pipeline_mode<synchronous>, transform_indices = @transform_11, window_bounds = array<i64: 1, 32>}, {transform_indices = @transform_12, window_bounds = array<i64: 16, 32>}]} {
    %c0 = arith.constant 0 : index
    %c0_0 = arith.constant 0 : index
    %0 = vector.load %arg1[%c0, %c0_0] : memref<16x288xbf16, #tpu.memory_space<vmem>>, vector<16x288xbf16>
    %c0_1 = arith.constant 0 : index
    %c0_2 = arith.constant 0 : index
    %1 = vector.load %arg2[%c0_1, %c0_2] : memref<288x32xbf16, #tpu.memory_space<vmem>>, vector<288x32xbf16>
    %cst = arith.constant dense<0.000000e+00> : vector<16x32xf32>
    %2 = tpu.matmul %0, %1, %cst {dimension_numbers = #tpu.dot_dimension_numbers<[1], [0], [0], [1], [0, 0, 1, 1], [], []>} : vector<16x288xbf16>, vector<288x32xbf16>, vector<16x32xf32> -> vector<16x32xf32>
    %c0_3 = arith.constant 0 : index
    %c0_4 = arith.constant 0 : index
    %3 = vector.load %arg3[%c0_3, %c0_4] : memref<1x32xf32, #tpu.memory_space<vmem>>, vector<1x32xf32>
    %4 = vector.broadcast %3 : vector<1x32xf32> to vector<16x32xf32>
    %5 = arith.addf %2, %4 : vector<16x32xf32>
    %cst_5 = arith.constant 0.000000e+00 : f32
    %6 = vector.broadcast %cst_5 : f32 to vector<16x32xf32>
    %7 = arith.maximumf %5, %6 : vector<16x32xf32>
    %cst_6 = arith.constant dense<0.000000e+00> : vector<32xf32>
    %8 = vector.multi_reduction <add>, %7, %cst_6 [0] : vector<16x32xf32> to vector<32xf32>
    %9 = vector.shape_cast %8 : vector<32xf32> to vector<1x32xf32>
    %cst_7 = arith.constant 1.600000e+01 : f32
    %10 = vector.broadcast %cst_7 : f32 to vector<1x32xf32>
    %11 = arith.divf %9, %10 : vector<1x32xf32>
    %12 = arith.truncf %11 : vector<1x32xf32> to vector<1x32xbf16>
    %c0_8 = arith.constant 0 : index
    %c0_9 = arith.constant 0 : index
    %13 = vector.load %arg4[%c0_8, %c0_9] : memref<32x6xbf16, #tpu.memory_space<vmem>>, vector<32x6xbf16>
    %cst_10 = arith.constant dense<0.000000e+00> : vector<1x6xf32>
    %14 = tpu.matmul %12, %13, %cst_10 {dimension_numbers = #tpu.dot_dimension_numbers<[1], [0], [0], [1], [0, 0, 1, 1], [], []>} : vector<1x32xbf16>, vector<32x6xbf16>, vector<1x6xf32> -> vector<1x6xf32>
    %c0_11 = arith.constant 0 : index
    %c0_12 = arith.constant 0 : index
    %15 = vector.load %arg5[%c0_11, %c0_12] : memref<1x6xf32, #tpu.memory_space<vmem>>, vector<1x6xf32>
    %16 = arith.addf %14, %15 : vector<1x6xf32>
    %cst_13 = arith.constant 0.000000e+00 : f32
    %17 = vector.broadcast %cst_13 : f32 to vector<1x6xf32>
    %18 = arith.maximumf %16, %17 : vector<1x6xf32>
    %19 = arith.truncf %18 : vector<1x6xf32> to vector<1x6xbf16>
    %c0_14 = arith.constant 0 : index
    %c0_15 = arith.constant 0 : index
    %20 = vector.load %arg6[%c0_14, %c0_15] : memref<6x32xbf16, #tpu.memory_space<vmem>>, vector<6x32xbf16>
    %cst_16 = arith.constant dense<0.000000e+00> : vector<1x32xf32>
    %21 = tpu.matmul %19, %20, %cst_16 {dimension_numbers = #tpu.dot_dimension_numbers<[1], [0], [0], [1], [0, 0, 1, 1], [], []>} : vector<1x6xbf16>, vector<6x32xbf16>, vector<1x32xf32> -> vector<1x32xf32>
    %c0_17 = arith.constant 0 : index
    %c0_18 = arith.constant 0 : index
    %22 = vector.load %arg7[%c0_17, %c0_18] : memref<1x32xf32, #tpu.memory_space<vmem>>, vector<1x32xf32>
    %23 = arith.addf %21, %22 : vector<1x32xf32>
    %cst_19 = arith.constant 0.000000e+00 : f32
    %24 = vector.broadcast %cst_19 : f32 to vector<1x32xf32>
    %25 = arith.subf %24, %23 : vector<1x32xf32>
    %26 = math.exp %25 : vector<1x32xf32>
    %cst_20 = arith.constant 1.000000e+00 : f32
    %27 = vector.broadcast %cst_20 : f32 to vector<1x32xf32>
    %28 = arith.addf %27, %26 : vector<1x32xf32>
    %cst_21 = arith.constant 1.000000e+00 : f32
    %29 = vector.broadcast %cst_21 : f32 to vector<1x32xf32>
    %30 = arith.divf %29, %28 : vector<1x32xf32>
    %31 = vector.broadcast %30 : vector<1x32xf32> to vector<16x32xf32>
    %32 = arith.mulf %7, %31 : vector<16x32xf32>
    %33 = arith.truncf %32 : vector<16x32xf32> to vector<16x32xbf16>
    %c0_22 = arith.constant 0 : index
    %c0_23 = arith.constant 0 : index
    %34 = vector.load %arg8[%c0_22, %c0_23] : memref<32x32xbf16, #tpu.memory_space<vmem>>, vector<32x32xbf16>
    %cst_24 = arith.constant dense<0.000000e+00> : vector<16x32xf32>
    %35 = tpu.matmul %33, %34, %cst_24 {dimension_numbers = #tpu.dot_dimension_numbers<[1], [0], [0], [1], [0, 0, 1, 1], [], []>} : vector<16x32xbf16>, vector<32x32xbf16>, vector<16x32xf32> -> vector<16x32xf32>
    %c0_25 = arith.constant 0 : index
    %c0_26 = arith.constant 0 : index
    %36 = vector.load %arg9[%c0_25, %c0_26] : memref<1x32xf32, #tpu.memory_space<vmem>>, vector<1x32xf32>
    %37 = vector.broadcast %36 : vector<1x32xf32> to vector<16x32xf32>
    %38 = arith.addf %35, %37 : vector<16x32xf32>
    %c0_27 = arith.constant 0 : index
    %c0_28 = arith.constant 0 : index
    %39 = vector.load %arg10[%c0_27, %c0_28] : memref<16x24xbf16, #tpu.memory_space<vmem>>, vector<16x24xbf16>
    %c0_29 = arith.constant 0 : index
    %c0_30 = arith.constant 0 : index
    %40 = vector.load %arg11[%c0_29, %c0_30] : memref<24x32xbf16, #tpu.memory_space<vmem>>, vector<24x32xbf16>
    %cst_31 = arith.constant dense<0.000000e+00> : vector<16x32xf32>
    %41 = tpu.matmul %39, %40, %cst_31 {dimension_numbers = #tpu.dot_dimension_numbers<[1], [0], [0], [1], [0, 0, 1, 1], [], []>} : vector<16x24xbf16>, vector<24x32xbf16>, vector<16x32xf32> -> vector<16x32xf32>
    %c0_32 = arith.constant 0 : index
    %c0_33 = arith.constant 0 : index
    %42 = vector.load %arg12[%c0_32, %c0_33] : memref<1x32xf32, #tpu.memory_space<vmem>>, vector<1x32xf32>
    %43 = vector.broadcast %42 : vector<1x32xf32> to vector<16x32xf32>
    %44 = arith.addf %41, %43 : vector<16x32xf32>
    %45 = arith.addf %38, %44 : vector<16x32xf32>
    %cst_34 = arith.constant 0.000000e+00 : f32
    %46 = vector.broadcast %cst_34 : f32 to vector<16x32xf32>
    %47 = arith.maximumf %45, %46 : vector<16x32xf32>
    %c0_35 = arith.constant 0 : index
    %c0_36 = arith.constant 0 : index
    %48 = vector.load %arg13[%c0_35, %c0_36] : memref<16x32xf32, #tpu.memory_space<vmem>>, vector<16x32xf32>
    tpu.vector_store %arg13[%c0_35, %c0_36], %47 {strides = array<i32>} : memref<16x32xf32, #tpu.memory_space<vmem>>, vector<16x32xf32>,
    return
  }
  func.func @transform_0(%arg0: i32) -> (i32, i32) {
    %c0_i32 = arith.constant 0 : i32
    %c0_i32_0 = arith.constant 0 : i32
    return %arg0, %c0_i32 : i32, i32
  }
  func.func @transform_1(%arg0: i32) -> (i32, i32) {
    %c0_i32 = arith.constant 0 : i32
    %c0_i32_0 = arith.constant 0 : i32
    %c0_i32_1 = arith.constant 0 : i32
    return %c0_i32, %c0_i32_0 : i32, i32
  }
  func.func @transform_2(%arg0: i32) -> (i32, i32) {
    %c0_i32 = arith.constant 0 : i32
    %c0_i32_0 = arith.constant 0 : i32
    %c0_i32_1 = arith.constant 0 : i32
    return %c0_i32, %c0_i32_0 : i32, i32
  }
  func.func @transform_3(%arg0: i32) -> (i32, i32) {
    %c0_i32 = arith.constant 0 : i32
    %c0_i32_0 = arith.constant 0 : i32
    %c0_i32_1 = arith.constant 0 : i32
    return %c0_i32, %c0_i32_0 : i32, i32
  }
  func.func @transform_4(%arg0: i32) -> (i32, i32) {
    %c0_i32 = arith.constant 0 : i32
    %c0_i32_0 = arith.constant 0 : i32
    %c0_i32_1 = arith.constant 0 : i32
    return %c0_i32, %c0_i32_0 : i32, i32
  }
  func.func @transform_5(%arg0: i32) -> (i32, i32) {
    %c0_i32 = arith.constant 0 : i32
    %c0_i32_0 = arith.constant 0 : i32
    %c0_i32_1 = arith.constant 0 : i32
    return %c0_i32, %c0_i32_0 : i32, i32
  }
  func.func @transform_6(%arg0: i32) -> (i32, i32) {
    %c0_i32 = arith.constant 0 : i32
    %c0_i32_0 = arith.constant 0 : i32
    %c0_i32_1 = arith.constant 0 : i32
    return %c0_i32, %c0_i32_0 : i32, i32
  }
  func.func @transform_7(%arg0: i32) -> (i32, i32) {
    %c0_i32 = arith.constant 0 : i32
    %c0_i32_0 = arith.constant 0 : i32
    %c0_i32_1 = arith.constant 0 : i32
    return %c0_i32, %c0_i32_0 : i32, i32
  }
  func.func @transform_8(%arg0: i32) -> (i32, i32) {
    %c0_i32 = arith.constant 0 : i32
    %c0_i32_0 = arith.constant 0 : i32
    %c0_i32_1 = arith.constant 0 : i32
    return %c0_i32, %c0_i32_0 : i32, i32
  }
  func.func @transform_9(%arg0: i32) -> (i32, i32) {
    %c0_i32 = arith.constant 0 : i32
    %c0_i32_0 = arith.constant 0 : i32
    return %arg0, %c0_i32 : i32, i32
  }
  func.func @transform_10(%arg0: i32) -> (i32, i32) {
    %c0_i32 = arith.constant 0 : i32
    %c0_i32_0 = arith.constant 0 : i32
    %c0_i32_1 = arith.constant 0 : i32
    return %c0_i32, %c0_i32_0 : i32, i32
  }
  func.func @transform_11(%arg0: i32) -> (i32, i32) {
    %c0_i32 = arith.constant 0 : i32
    %c0_i32_0 = arith.constant 0 : i32
    %c0_i32_1 = arith.constant 0 : i32
    return %c0_i32, %c0_i32_0 : i32, i32
  }
  func.func @transform_12(%arg0: i32) -> (i32, i32) {
    %c0_i32 = arith.constant 0 : i32
    %c0_i32_0 = arith.constant 0 : i32
    return %arg0, %c0_i32 : i32, i32
  }
}

module attributes {stable_mosaic.version = 11 : i64} {
  func.func @_head_kernel(%arg0: memref<2x16x32xf32, #tpu.memory_space<vmem>>, %arg1: memref<2x1xf32, #tpu.memory_space<vmem>>) attributes {dimension_semantics = [], scalar_prefetch = 0 : i64, scratch_operands = 0 : i64, tpu.core_type = #tpu.core_type<tc>} {
    %c0 = arith.constant 0 : index
    %c0_0 = arith.constant 0 : index
    %c0_1 = arith.constant 0 : index
    %0 = vector.load %arg0[%c0, %c0_0, %c0_1] : memref<2x16x32xf32, #tpu.memory_space<vmem>>, vector<2x16x32xf32>
    %cst = arith.constant dense<0.000000e+00> : vector<2x32xf32>
    %1 = vector.multi_reduction <add>, %0, %cst [1] : vector<2x16x32xf32> to vector<2x32xf32>
    %cst_2 = arith.constant 1.600000e+01 : f32
    %2 = vector.broadcast %cst_2 : f32 to vector<2x32xf32>
    %3 = arith.divf %1, %2 : vector<2x32xf32>
    %cst_3 = arith.constant dense<0.000000e+00> : vector<2xf32>
    %4 = vector.multi_reduction <add>, %3, %cst_3 [1] : vector<2x32xf32> to vector<2xf32>
    %5 = vector.shape_cast %4 : vector<2xf32> to vector<2x1xf32>
    %cst_4 = arith.constant 3.200000e+01 : f32
    %6 = vector.broadcast %cst_4 : f32 to vector<2x1xf32>
    %7 = arith.divf %5, %6 : vector<2x1xf32>
    %c0_5 = arith.constant 0 : index
    %c0_6 = arith.constant 0 : index
    %8 = vector.load %arg1[%c0_5, %c0_6] : memref<2x1xf32, #tpu.memory_space<vmem>>, vector<2x1xf32>
    tpu.vector_store %arg1[%c0_5, %c0_6], %7 {strides = array<i32>} : memref<2x1xf32, #tpu.memory_space<vmem>>, vector<2x1xf32>,
    return
  }
}

</mosaic_0001>

<bundles_post_ra>
// kernel: _lambda_.7
= control target key start
LH: loop header
LB: loop body
LE: loop exit
PB: predicated region body
PF: predicated region fallthrough
CT: control target
= control target key end

     0   :  { %vm254_vm0 = vcmask 130048   ;;  %vm960_vm1 = vcmask 191488   ;;  %s1833_s1 = inlined_call_operand.vmem [shape: bf16[16,24], index: 1, kind: input, shape index: {}]   ;;  %s1834_s0 = inlined_call_operand.vmem [shape: bf16[512,16], index: 0, kind: input, shape index: {}]   ;;  %s1835_s2 = inlined_call_operand.vmem [shape: f32[1,24], index: 2, kind: input, shape index: {}]   ;;  %s1836_s3 = inlined_call_operand.vmem [shape: bf16[512,24], index: 3, kind: output, shape index: {}]  }
   0x1   :  { %v1324_v0 = vld [vmem:[%s1833_s1] sm:$0xff]   ;;  %v1327_v3 = vld [vmem:[%s1834_s0 + $0x8] sm:$0xff]   ;;  %v1329_v5 = vld [vmem:[%s1834_s0 + $0x10] sm:$0xff]  }
   0x2   :  { %v1325_v1 = vld [vmem:[%s1834_s0] sm:$0xff]   ;;  %1256 = vmatprep.subr.bf16.mxu0 %v1324_v0  ;;  %1322 = vmatprep.subr.bf16.mxu1 %v1324_v0  ;;  %v1328_v4 = vld [vmem:[%s1834_s0 + $0x88] sm:$0xff]   ;;  %v1330_v6 = vld [vmem:[%s1834_s0 + $0x90] sm:$0xff]  }
   0x3   :  { %v1326_v2 = vld [vmem:[%s1834_s0 + $0x80] sm:$0xff]   ;;  %1257 = vmatpush3.bf16.msra.mxu0 %v1324_v0  ;;  %1323 = vmatpush3.bf16.msra.mxu1 %v1324_v0  ;;  %v1331_v7 = vld [vmem:[%s1834_s0 + $0x18] sm:$0xff]   ;;  %v1335_v11 = vld [vmem:[%s1834_s0 + $0x28] sm:$0xff]  }
   0x4   :  { %1258 = vmatprep.mubr.msk.bf16.mxu0 %vm254_vm0, %v1325_v1  ;;  %1290 = vmatprep.mubr.msk.bf16.mxu1 %vm254_vm0, %v1326_v2  ;;  %v1332_v8 = vld [vmem:[%s1834_s0 + $0x98] sm:$0xff]   ;;  %v1333_v9 = vld [vmem:[%s1834_s0 + $0x20] sm:$0xff]   ;;  %v1336_v12 = vld [vmem:[%s1834_s0 + $0xa8] sm:$0xff]  }
   0x5   :  { %v1334_v10 = vld [vmem:[%s1834_s0 + $0xa0] sm:$0xff]   ;;  %v1337_v13 = vld [vmem:[%s1834_s0 + $0x30] sm:$0xff]   ;;  %v1339_v15 = vld [vmem:[%s1834_s0 + $0x38] sm:$0xff]  }
   0x6   :  { %1259 = vmatmul.mubr.msk.bf16.vlgmr.msra.gmra.mxu0 %vm254_vm0, %v1327_v3  ;;  %1291 = vmatmul.mubr.msk.bf16.vlgmr.msra.gmra.mxu1 %vm254_vm0, %v1328_v4  ;;  %v1338_v14 = vld [vmem:[%s1834_s0 + $0xb0] sm:$0xff]   ;;  %v1340_v16 = vld [vmem:[%s1834_s0 + $0xb8] sm:$0xff]   ;;  %v1341_v17 = vld [vmem:[%s1834_s0 + $0x40] sm:$0xff]  }
   0x7   :  { %1262 = vmatprep.mubr.msk.bf16.mxu0 %vm254_vm0, %v1329_v5  ;;  %1294 = vmatprep.mubr.msk.bf16.mxu1 %vm254_vm0, %v1330_v6  ;;  %v1342_v18 = vld [vmem:[%s1834_s0 + $0xc0] sm:$0xff]   ;;  %v1343_v19 = vld [vmem:[%s1834_s0 + $0x48] sm:$0xff]   ;;  %v1345_v21 = vld [vmem:[%s1834_s0 + $0x50] sm:$0xff]  }
   0x8   :  { %v1344_v20 = vld [vmem:[%s1834_s0 + $0xc8] sm:$0xff]   ;;  %v1346_v22 = vld [vmem:[%s1834_s0 + $0xd0] sm:$0xff]   ;;  %v1347_v23 = vld [vmem:[%s1834_s0 + $0x58] sm:$0xff]  }
   0x9   :  { %v1348_v24 = vld [vmem:[%s1834_s0 + $0xd8] sm:$0xff]   ;;  %v1349_v25 = vld [vmem:[%s1834_s0 + $0x60] sm:$0xff]   ;;  %v1351_v27 = vld [vmem:[%s1834_s0 + $0x68] sm:$0xff]  }
   0xa   :  { %v1350_v26 = vld [vmem:[%s1834_s0 + $0xe0] sm:$0xff]   ;;  %v1352_v28 = vld [vmem:[%s1834_s0 + $0xe8] sm:$0xff]   ;;  %v1353_v29 = vld [vmem:[%s1834_s0 + $0x70] sm:$0xff]  }
   0xb   :  { %v1354_v30 = vld [vmem:[%s1834_s0 + $0xf0] sm:$0xff]   ;;  %v1355_v31 = vld [vmem:[%s1834_s0 + $0x78] sm:$0xff]   ;;  %v1511_v33 = vld [vmem:[%s1835_s2] ss:$0 sm:$0xff] }
   0xc   :  { %v1356_v32 = vld [vmem:[%s1834_s0 + $0xf8] sm:$0xff]  }
   0xe   :  { %1263 = vmatmul.mubr.msk.bf16.gmra.mxu0 %vm254_vm0, %v1331_v7  ;;  %1295 = vmatmul.mubr.msk.bf16.gmra.mxu1 %vm254_vm0, %v1332_v8 }
   0xf   :  { %1266 = vmatprep.mubr.msk.bf16.mxu0 %vm254_vm0, %v1333_v9  ;;  %1298 = vmatprep.mubr.msk.bf16.mxu1 %vm254_vm0, %v1334_v10 }
  0x16   :  { %1267 = vmatmul.mubr.msk.bf16.gmra.mxu0 %vm254_vm0, %v1335_v11  ;;  %1299 = vmatmul.mubr.msk.bf16.gmra.mxu1 %vm254_vm0, %v1336_v12 }
  0x17   :  { %1270 = vmatprep.mubr.msk.bf16.mxu0 %vm254_vm0, %v1337_v13  ;;  %1302 = vmatprep.mubr.msk.bf16.mxu1 %vm254_vm0, %v1338_v14 }
  0x1e   :  { %1271 = vmatmul.mubr.msk.bf16.gmra.mxu0 %vm254_vm0, %v1339_v15  ;;  %1303 = vmatmul.mubr.msk.bf16.gmra.mxu1 %vm254_vm0, %v1340_v16 }
  0x1f   :  { %1274 = vmatprep.mubr.msk.bf16.mxu0 %vm254_vm0, %v1341_v17  ;;  %1306 = vmatprep.mubr.msk.bf16.mxu1 %vm254_vm0, %v1342_v18 }
  0x26   :  { %1275 = vmatmul.mubr.msk.bf16.gmra.mxu0 %vm254_vm0, %v1343_v19  ;;  %1307 = vmatmul.mubr.msk.bf16.gmra.mxu1 %vm254_vm0, %v1344_v20 }
  0x27   :  { %1278 = vmatprep.mubr.msk.bf16.mxu0 %vm254_vm0, %v1345_v21  ;;  %1310 = vmatprep.mubr.msk.bf16.mxu1 %vm254_vm0, %v1346_v22 }
  0x2e   :  { %1279 = vmatmul.mubr.msk.bf16.gmra.mxu0 %vm254_vm0, %v1347_v23  ;;  %1311 = vmatmul.mubr.msk.bf16.gmra.mxu1 %vm254_vm0, %v1348_v24 }
  0x2f   :  { %1282 = vmatprep.mubr.msk.bf16.mxu0 %vm254_vm0, %v1349_v25  ;;  %1314 = vmatprep.mubr.msk.bf16.mxu1 %vm254_vm0, %v1350_v26 }
  0x36   :  { %1283 = vmatmul.mubr.msk.bf16.gmra.mxu0 %vm254_vm0, %v1351_v27  ;;  %1315 = vmatmul.mubr.msk.bf16.gmra.mxu1 %vm254_vm0, %v1352_v28 }
  0x37   :  { %1286 = vmatprep.mubr.msk.bf16.mxu0 %vm254_vm0, %v1353_v29  ;;  %1318 = vmatprep.mubr.msk.bf16.mxu1 %vm254_vm0, %v1354_v30 }
  0x3e   :  { %1287 = vmatmul.mubr.msk.bf16.gmra.mxu0 %vm254_vm0, %v1355_v31  ;;  %1319 = vmatmul.mubr.msk.bf16.gmra.mxu1 %vm254_vm0, %v1356_v32 }
  0xc6   :  { %v1260_v34 = vpop.f32.mrf.mxu0  ;;  %v1292_v35 = vpop.f32.mrf.mxu1 }
  0xc7   :  { %v394_v36 = vadd.f32 %v1260_v34, %v1511_v33  ;;  %v522_v37 = vadd.f32 %v1292_v35, %v1511_v33 }
  0xc8   :  { %v385_v38 = vpop.f32.mrf.mxu0  ;;  %v513_v39 = vpop.f32.mrf.mxu1 }
  0xc9   :  { %v642_v40 = vmax.f32 %v394_v36, 0.0  ;;  %v674_v41 = vmax.f32 %v522_v37, 0.0  ;;  %v386_v42 = vadd.f32 %v1511_v33, %v385_v38  ;;  %v514_v43 = vadd.f32 %v1511_v33, %v513_v39 }
  0xca   :  { %v1261_v44 = vpop.f32.mrf.mxu0  ;;  %v1293_v45 = vpop.f32.mrf.mxu1 }
  0xcb   :  { %v1161_v46 = vpack.c.bf16 %v642_v40, %v642_v40  ;;  %v1193_v47 = vpack.c.bf16 %v674_v41, %v674_v41  ;;  %v640_v48 = vmax.f32 %v386_v42, 0.0  ;;  %v672_v49 = vmax.f32 %v514_v43, 0.0 }
  0xcc   :  { %v397_v50 = vadd.f32 %v1261_v44, %v1511_v33  ;;  %v525_v51 = vadd.f32 %v1293_v45, %v1511_v33  ;;  %v388_v52 = vpop.f32.mrf.mxu0  ;;  %v516_v53 = vpop.f32.mrf.mxu1 }
  0xcd   :  { %963 = vst.msk [vmem:[%s1836_s3 + $0x8] sm:$0xf] %vm960_vm1, %v1161_v46  ;;  %995 = vst.msk [vmem:[%s1836_s3 + $0x88] sm:$0xf] %vm960_vm1, %v1193_v47  ;;  %v1159_v54 = vpack.c.bf16 %v640_v48, %v640_v48  ;;  %v1191_v55 = vpack.c.bf16 %v672_v49, %v672_v49  ;;  %v389_v56 = vadd.f32 %v1511_v33, %v388_v52 }
  0xce   :  { %v517_v57 = vadd.f32 %v1511_v33, %v516_v53  ;;  %v643_v58 = vmax.f32 %v397_v50, 0.0  ;;  %v675_v59 = vmax.f32 %v525_v51, 0.0  ;;  %v1264_v60 = vpop.f32.mrf.mxu0  ;;  %v1296_v61 = vpop.f32.mrf.mxu1 }
  0xcf   :  { %961 = vst.msk [vmem:[%s1836_s3] sm:$0xf] %vm960_vm1, %v1159_v54  ;;  %993 = vst.msk [vmem:[%s1836_s3 + $0x80] sm:$0xf] %vm960_vm1, %v1191_v55  ;;  %v641_v62 = vmax.f32 %v389_v56, 0.0  ;;  %v410_v0 = vadd.f32 %v1264_v60, %v1511_v33  ;;  %v538_v1 = vadd.f32 %v1296_v61, %v1511_v33 }
  0xd0   :  { %v673_v63 = vmax.f32 %v517_v57, 0.0  ;;  %v1162_v2 = vpack.c.bf16 %v643_v58, %v643_v58  ;;  %v1194_v3 = vpack.c.bf16 %v675_v59, %v675_v59  ;;  %v401_v4 = vpop.f32.mrf.mxu0  ;;  %v529_v5 = vpop.f32.mrf.mxu1 }
  0xd1   :  { %v1160_v6 = vpack.c.bf16 %v641_v62, %v641_v62  ;;  %v646_v8 = vmax.f32 %v410_v0, 0.0  ;;  %v678_v9 = vmax.f32 %v538_v1, 0.0  ;;  %v402_v10 = vadd.f32 %v1511_v33, %v401_v4 }
  0xd2   :  { %v1192_v7 = vpack.c.bf16 %v673_v63, %v673_v63  ;;  %964 = vst.msk [vmem:[%s1836_s3 + $0xc] sm:$0xf] %vm960_vm1, %v1162_v2  ;;  %996 = vst.msk [vmem:[%s1836_s3 + $0x8c] sm:$0xf] %vm960_vm1, %v1194_v3  ;;  %v530_v11 = vadd.f32 %v1511_v33, %v529_v5  ;;  %v1265_v12 = vpop.f32.mrf.mxu0  ;;  %v1297_v13 = vpop.f32.mrf.mxu1 }
  0xd3   :  { %962 = vst.msk [vmem:[%s1836_s3 + $0x4] sm:$0xf] %vm960_vm1, %v1160_v6  ;;  %v1165_v14 = vpack.c.bf16 %v646_v8, %v646_v8  ;;  %v1197_v15 = vpack.c.bf16 %v678_v9, %v678_v9  ;;  %v413_v16 = vadd.f32 %v1265_v12, %v1511_v33  ;;  %v541_v17 = vadd.f32 %v1297_v13, %v1511_v33 }
  0xd4   :  { %994 = vst.msk [vmem:[%s1836_s3 + $0x84] sm:$0xf] %vm960_vm1, %v1192_v7  ;;  %v644_v18 = vmax.f32 %v402_v10, 0.0  ;;  %v676_v19 = vmax.f32 %v530_v11, 0.0  ;;  %v404_v20 = vpop.f32.mrf.mxu0  ;;  %v532_v21 = vpop.f32.mrf.mxu1 }
  0xd5   :  { %967 = vst.msk [vmem:[%s1836_s3 + $0x18] sm:$0xf] %vm960_vm1, %v1165_v14  ;;  %999 = vst.msk [vmem:[%s1836_s3 + $0x98] sm:$0xf] %vm960_vm1, %v1197_v15  ;;  %v647_v22 = vmax.f32 %v413_v16, 0.0  ;;  %v679_v23 = vmax.f32 %v541_v17, 0.0  ;;  %v405_v24 = vadd.f32 %v1511_v33, %v404_v20  ;;  %v533_v25 = vadd.f32 %v1511_v33, %v532_v21 }
  0xd6   :  { %v1163_v26 = vpack.c.bf16 %v644_v18, %v644_v18  ;;  %v1195_v27 = vpack.c.bf16 %v676_v19, %v676_v19  ;;  %v1268_v28 = vpop.f32.mrf.mxu0  ;;  %v1300_v29 = vpop.f32.mrf.mxu1 }
  0xd7   :  { %v1166_v30 = vpack.c.bf16 %v647_v22, %v647_v22  ;;  %v1198_v31 = vpack.c.bf16 %v679_v23, %v679_v23  ;;  %v645_v32 = vmax.f32 %v405_v24, 0.0  ;;  %v677_v34 = vmax.f32 %v533_v25, 0.0 }
  0xd8   :  { %965 = vst.msk [vmem:[%s1836_s3 + $0x10] sm:$0xf] %vm960_vm1, %v1163_v26  ;;  %997 = vst.msk [vmem:[%s1836_s3 + $0x90] sm:$0xf] %vm960_vm1, %v1195_v27  ;;  %v426_v35 = vadd.f32 %v1268_v28, %v1511_v33  ;;  %v554_v36 = vadd.f32 %v1300_v29, %v1511_v33  ;;  %v417_v37 = vpop.f32.mrf.mxu0  ;;  %v545_v38 = vpop.f32.mrf.mxu1 }
  0xd9   :  { %968 = vst.msk [vmem:[%s1836_s3 + $0x1c] sm:$0xf] %vm960_vm1, %v1166_v30  ;;  %1000 = vst.msk [vmem:[%s1836_s3 + $0x9c] sm:$0xf] %vm960_vm1, %v1198_v31  ;;  %v1164_v39 = vpack.c.bf16 %v645_v32, %v645_v32  ;;  %v1196_v40 = vpack.c.bf16 %v677_v34, %v677_v34  ;;  %v418_v41 = vadd.f32 %v1511_v33, %v417_v37 }
  0xda   :  { %v546_v42 = vadd.f32 %v1511_v33, %v545_v38  ;;  %v650_v43 = vmax.f32 %v426_v35, 0.0  ;;  %v682_v44 = vmax.f32 %v554_v36, 0.0  ;;  %v1269_v45 = vpop.f32.mrf.mxu0  ;;  %v1301_v46 = vpop.f32.mrf.mxu1 }
  0xdb   :  { %966 = vst.msk [vmem:[%s1836_s3 + $0x14] sm:$0xf] %vm960_vm1, %v1164_v39  ;;  %998 = vst.msk [vmem:[%s1836_s3 + $0x94] sm:$0xf] %vm960_vm1, %v1196_v40  ;;  %v648_v47 = vmax.f32 %v418_v41, 0.0  ;;  %v429_v49 = vadd.f32 %v1269_v45, %v1511_v33  ;;  %v557_v50 = vadd.f32 %v1301_v46, %v1511_v33 }
  0xdc   :  { %v680_v48 = vmax.f32 %v546_v42, 0.0  ;;  %v1169_v51 = vpack.c.bf16 %v650_v43, %v650_v43  ;;  %v1201_v52 = vpack.c.bf16 %v682_v44, %v682_v44  ;;  %v420_v53 = vpop.f32.mrf.mxu0  ;;  %v548_v54 = vpop.f32.mrf.mxu1 }
  0xdd   :  { %v1167_v55 = vpack.c.bf16 %v648_v47, %v648_v47  ;;  %v651_v57 = vmax.f32 %v429_v49, 0.0  ;;  %v683_v58 = vmax.f32 %v557_v50, 0.0  ;;  %v421_v59 = vadd.f32 %v1511_v33, %v420_v53 }
  0xde   :  { %v1199_v56 = vpack.c.bf16 %v680_v48, %v680_v48  ;;  %971 = vst.msk [vmem:[%s1836_s3 + $0x28] sm:$0xf] %vm960_vm1, %v1169_v51  ;;  %1003 = vst.msk [vmem:[%s1836_s3 + $0xa8] sm:$0xf] %vm960_vm1, %v1201_v52  ;;  %v549_v60 = vadd.f32 %v1511_v33, %v548_v54  ;;  %v1272_v61 = vpop.f32.mrf.mxu0  ;;  %v1304_v62 = vpop.f32.mrf.mxu1 }
  0xdf   :  { %969 = vst.msk [vmem:[%s1836_s3 + $0x20] sm:$0xf] %vm960_vm1, %v1167_v55  ;;  %v1170_v63 = vpack.c.bf16 %v651_v57, %v651_v57  ;;  %v1202_v0 = vpack.c.bf16 %v683_v58, %v683_v58  ;;  %v442_v1 = vadd.f32 %v1272_v61, %v1511_v33  ;;  %v570_v2 = vadd.f32 %v1304_v62, %v1511_v33 }
  0xe0   :  { %1001 = vst.msk [vmem:[%s1836_s3 + $0xa0] sm:$0xf] %vm960_vm1, %v1199_v56  ;;  %v649_v3 = vmax.f32 %v421_v59, 0.0  ;;  %v681_v4 = vmax.f32 %v549_v60, 0.0  ;;  %v433_v5 = vpop.f32.mrf.mxu0  ;;  %v561_v6 = vpop.f32.mrf.mxu1 }
  0xe1   :  { %972 = vst.msk [vmem:[%s1836_s3 + $0x2c] sm:$0xf] %vm960_vm1, %v1170_v63  ;;  %1004 = vst.msk [vmem:[%s1836_s3 + $0xac] sm:$0xf] %vm960_vm1, %v1202_v0  ;;  %v654_v7 = vmax.f32 %v442_v1, 0.0  ;;  %v686_v8 = vmax.f32 %v570_v2, 0.0  ;;  %v434_v9 = vadd.f32 %v1511_v33, %v433_v5  ;;  %v562_v10 = vadd.f32 %v1511_v33, %v561_v6 }
  0xe2   :  { %v1168_v11 = vpack.c.bf16 %v649_v3, %v649_v3  ;;  %v1200_v12 = vpack.c.bf16 %v681_v4, %v681_v4  ;;  %v1273_v13 = vpop.f32.mrf.mxu0  ;;  %v1305_v14 = vpop.f32.mrf.mxu1 }
  0xe3   :  { %v1173_v15 = vpack.c.bf16 %v654_v7, %v654_v7  ;;  %v1205_v16 = vpack.c.bf16 %v686_v8, %v686_v8  ;;  %v652_v17 = vmax.f32 %v434_v9, 0.0  ;;  %v684_v18 = vmax.f32 %v562_v10, 0.0 }
  0xe4   :  { %970 = vst.msk [vmem:[%s1836_s3 + $0x24] sm:$0xf] %vm960_vm1, %v1168_v11  ;;  %1002 = vst.msk [vmem:[%s1836_s3 + $0xa4] sm:$0xf] %vm960_vm1, %v1200_v12  ;;  %v445_v19 = vadd.f32 %v1273_v13, %v1511_v33  ;;  %v573_v20 = vadd.f32 %v1305_v14, %v1511_v33  ;;  %v436_v21 = vpop.f32.mrf.mxu0  ;;  %v564_v22 = vpop.f32.mrf.mxu1 }
  0xe5   :  { %975 = vst.msk [vmem:[%s1836_s3 + $0x38] sm:$0xf] %vm960_vm1, %v1173_v15  ;;  %1007 = vst.msk [vmem:[%s1836_s3 + $0xb8] sm:$0xf] %vm960_vm1, %v1205_v16  ;;  %v1171_v23 = vpack.c.bf16 %v652_v17, %v652_v17  ;;  %v1203_v24 = vpack.c.bf16 %v684_v18, %v684_v18  ;;  %v437_v25 = vadd.f32 %v1511_v33, %v436_v21 }
  0xe6   :  { %v565_v26 = vadd.f32 %v1511_v33, %v564_v22  ;;  %v655_v27 = vmax.f32 %v445_v19, 0.0  ;;  %v687_v28 = vmax.f32 %v573_v20, 0.0  ;;  %v1276_v29 = vpop.f32.mrf.mxu0  ;;  %v1308_v30 = vpop.f32.mrf.mxu1 }
  0xe7   :  { %973 = vst.msk [vmem:[%s1836_s3 + $0x30] sm:$0xf] %vm960_vm1, %v1171_v23  ;;  %1005 = vst.msk [vmem:[%s1836_s3 + $0xb0] sm:$0xf] %vm960_vm1, %v1203_v24  ;;  %v653_v31 = vmax.f32 %v437_v25, 0.0  ;;  %v458_v34 = vadd.f32 %v1276_v29, %v1511_v33  ;;  %v586_v35 = vadd.f32 %v1308_v30, %v1511_v33 }
  0xe8   :  { %v685_v32 = vmax.f32 %v565_v26, 0.0  ;;  %v1174_v36 = vpack.c.bf16 %v655_v27, %v655_v27  ;;  %v1206_v37 = vpack.c.bf16 %v687_v28, %v687_v28  ;;  %v449_v38 = vpop.f32.mrf.mxu0  ;;  %v577_v39 = vpop.f32.mrf.mxu1 }
  0xe9   :  { %v1172_v40 = vpack.c.bf16 %v653_v31, %v653_v31  ;;  %v658_v42 = vmax.f32 %v458_v34, 0.0  ;;  %v690_v43 = vmax.f32 %v586_v35, 0.0  ;;  %v450_v44 = vadd.f32 %v1511_v33, %v449_v38 }
  0xea   :  { %v1204_v41 = vpack.c.bf16 %v685_v32, %v685_v32  ;;  %976 = vst.msk [vmem:[%s1836_s3 + $0x3c] sm:$0xf] %vm960_vm1, %v1174_v36  ;;  %1008 = vst.msk [vmem:[%s1836_s3 + $0xbc] sm:$0xf] %vm960_vm1, %v1206_v37  ;;  %v578_v45 = vadd.f32 %v1511_v33, %v577_v39  ;;  %v1277_v46 = vpop.f32.mrf.mxu0  ;;  %v1309_v47 = vpop.f32.mrf.mxu1 }
  0xeb   :  { %974 = vst.msk [vmem:[%s1836_s3 + $0x34] sm:$0xf] %vm960_vm1, %v1172_v40  ;;  %v1177_v48 = vpack.c.bf16 %v658_v42, %v658_v42  ;;  %v1209_v49 = vpack.c.bf16 %v690_v43, %v690_v43  ;;  %v461_v50 = vadd.f32 %v1277_v46, %v1511_v33  ;;  %v589_v51 = vadd.f32 %v1309_v47, %v1511_v33 }
  0xec   :  { %1006 = vst.msk [vmem:[%s1836_s3 + $0xb4] sm:$0xf] %vm960_vm1, %v1204_v41  ;;  %v656_v52 = vmax.f32 %v450_v44, 0.0  ;;  %v688_v53 = vmax.f32 %v578_v45, 0.0  ;;  %v452_v54 = vpop.f32.mrf.mxu0  ;;  %v580_v55 = vpop.f32.mrf.mxu1 }
  0xed   :  { %979 = vst.msk [vmem:[%s1836_s3 + $0x48] sm:$0xf] %vm960_vm1, %v1177_v48  ;;  %1011 = vst.msk [vmem:[%s1836_s3 + $0xc8] sm:$0xf] %vm960_vm1, %v1209_v49  ;;  %v659_v56 = vmax.f32 %v461_v50, 0.0  ;;  %v691_v57 = vmax.f32 %v589_v51, 0.0  ;;  %v453_v58 = vadd.f32 %v1511_v33, %v452_v54  ;;  %v581_v59 = vadd.f32 %v1511_v33, %v580_v55 }
  0xee   :  { %v1175_v60 = vpack.c.bf16 %v656_v52, %v656_v52  ;;  %v1207_v61 = vpack.c.bf16 %v688_v53, %v688_v53  ;;  %v1280_v62 = vpop.f32.mrf.mxu0  ;;  %v1312_v63 = vpop.f32.mrf.mxu1 }
  0xef   :  { %v1178_v0 = vpack.c.bf16 %v659_v56, %v659_v56  ;;  %v1210_v1 = vpack.c.bf16 %v691_v57, %v691_v57  ;;  %v657_v2 = vmax.f32 %v453_v58, 0.0  ;;  %v689_v3 = vmax.f32 %v581_v59, 0.0 }
  0xf0   :  { %977 = vst.msk [vmem:[%s1836_s3 + $0x40] sm:$0xf] %vm960_vm1, %v1175_v60  ;;  %1009 = vst.msk [vmem:[%s1836_s3 + $0xc0] sm:$0xf] %vm960_vm1, %v1207_v61  ;;  %v474_v4 = vadd.f32 %v1280_v62, %v1511_v33  ;;  %v602_v5 = vadd.f32 %v1312_v63, %v1511_v33  ;;  %v465_v6 = vpop.f32.mrf.mxu0  ;;  %v593_v7 = vpop.f32.mrf.mxu1 }
  0xf1   :  { %980 = vst.msk [vmem:[%s1836_s3 + $0x4c] sm:$0xf] %vm960_vm1, %v1178_v0  ;;  %1012 = vst.msk [vmem:[%s1836_s3 + $0xcc] sm:$0xf] %vm960_vm1, %v1210_v1  ;;  %v1176_v8 = vpack.c.bf16 %v657_v2, %v657_v2  ;;  %v1208_v9 = vpack.c.bf16 %v689_v3, %v689_v3  ;;  %v466_v10 = vadd.f32 %v1511_v33, %v465_v6 }
  0xf2   :  { %v594_v11 = vadd.f32 %v1511_v33, %v593_v7  ;;  %v662_v12 = vmax.f32 %v474_v4, 0.0  ;;  %v694_v13 = vmax.f32 %v602_v5, 0.0  ;;  %v1281_v14 = vpop.f32.mrf.mxu0  ;;  %v1313_v15 = vpop.f32.mrf.mxu1 }
  0xf3   :  { %978 = vst.msk [vmem:[%s1836_s3 + $0x44] sm:$0xf] %vm960_vm1, %v1176_v8  ;;  %1010 = vst.msk [vmem:[%s1836_s3 + $0xc4] sm:$0xf] %vm960_vm1, %v1208_v9  ;;  %v660_v16 = vmax.f32 %v466_v10, 0.0  ;;  %v477_v18 = vadd.f32 %v1281_v14, %v1511_v33  ;;  %v605_v19 = vadd.f32 %v1313_v15, %v1511_v33 }
  0xf4   :  { %v692_v17 = vmax.f32 %v594_v11, 0.0  ;;  %v1181_v20 = vpack.c.bf16 %v662_v12, %v662_v12  ;;  %v1213_v21 = vpack.c.bf16 %v694_v13, %v694_v13  ;;  %v468_v22 = vpop.f32.mrf.mxu0  ;;  %v596_v23 = vpop.f32.mrf.mxu1 }
  0xf5   :  { %v1179_v24 = vpack.c.bf16 %v660_v16, %v660_v16  ;;  %v663_v26 = vmax.f32 %v477_v18, 0.0  ;;  %v695_v27 = vmax.f32 %v605_v19, 0.0  ;;  %v469_v28 = vadd.f32 %v1511_v33, %v468_v22 }
  0xf6   :  { %v1211_v25 = vpack.c.bf16 %v692_v17, %v692_v17  ;;  %983 = vst.msk [vmem:[%s1836_s3 + $0x58] sm:$0xf] %vm960_vm1, %v1181_v20  ;;  %1015 = vst.msk [vmem:[%s1836_s3 + $0xd8] sm:$0xf] %vm960_vm1, %v1213_v21  ;;  %v597_v29 = vadd.f32 %v1511_v33, %v596_v23  ;;  %v1284_v30 = vpop.f32.mrf.mxu0  ;;  %v1316_v31 = vpop.f32.mrf.mxu1 }
  0xf7   :  { %981 = vst.msk [vmem:[%s1836_s3 + $0x50] sm:$0xf] %vm960_vm1, %v1179_v24  ;;  %v1182_v32 = vpack.c.bf16 %v663_v26, %v663_v26  ;;  %v1214_v34 = vpack.c.bf16 %v695_v27, %v695_v27  ;;  %v490_v35 = vadd.f32 %v1284_v30, %v1511_v33  ;;  %v618_v36 = vadd.f32 %v1316_v31, %v1511_v33 }
  0xf8   :  { %1013 = vst.msk [vmem:[%s1836_s3 + $0xd0] sm:$0xf] %vm960_vm1, %v1211_v25  ;;  %v661_v37 = vmax.f32 %v469_v28, 0.0  ;;  %v693_v38 = vmax.f32 %v597_v29, 0.0  ;;  %v481_v39 = vpop.f32.mrf.mxu0  ;;  %v609_v40 = vpop.f32.mrf.mxu1 }
  0xf9   :  { %984 = vst.msk [vmem:[%s1836_s3 + $0x5c] sm:$0xf] %vm960_vm1, %v1182_v32  ;;  %1016 = vst.msk [vmem:[%s1836_s3 + $0xdc] sm:$0xf] %vm960_vm1, %v1214_v34  ;;  %v666_v41 = vmax.f32 %v490_v35, 0.0  ;;  %v698_v42 = vmax.f32 %v618_v36, 0.0  ;;  %v482_v43 = vadd.f32 %v1511_v33, %v481_v39  ;;  %v610_v44 = vadd.f32 %v1511_v33, %v609_v40 }
  0xfa   :  { %v1180_v45 = vpack.c.bf16 %v661_v37, %v661_v37  ;;  %v1212_v46 = vpack.c.bf16 %v693_v38, %v693_v38  ;;  %v1285_v47 = vpop.f32.mrf.mxu0  ;;  %v1317_v48 = vpop.f32.mrf.mxu1 }
  0xfb   :  { %v1185_v49 = vpack.c.bf16 %v666_v41, %v666_v41  ;;  %v1217_v50 = vpack.c.bf16 %v698_v42, %v698_v42  ;;  %v664_v51 = vmax.f32 %v482_v43, 0.0  ;;  %v696_v52 = vmax.f32 %v610_v44, 0.0 }
  0xfc   :  { %982 = vst.msk [vmem:[%s1836_s3 + $0x54] sm:$0xf] %vm960_vm1, %v1180_v45  ;;  %1014 = vst.msk [vmem:[%s1836_s3 + $0xd4] sm:$0xf] %vm960_vm1, %v1212_v46  ;;  %v493_v53 = vadd.f32 %v1285_v47, %v1511_v33  ;;  %v621_v54 = vadd.f32 %v1317_v48, %v1511_v33  ;;  %v484_v55 = vpop.f32.mrf.mxu0  ;;  %v612_v56 = vpop.f32.mrf.mxu1 }
  0xfd   :  { %987 = vst.msk [vmem:[%s1836_s3 + $0x68] sm:$0xf] %vm960_vm1, %v1185_v49  ;;  %1019 = vst.msk [vmem:[%s1836_s3 + $0xe8] sm:$0xf] %vm960_vm1, %v1217_v50  ;;  %v1183_v57 = vpack.c.bf16 %v664_v51, %v664_v51  ;;  %v1215_v58 = vpack.c.bf16 %v696_v52, %v696_v52  ;;  %v485_v59 = vadd.f32 %v1511_v33, %v484_v55 }
  0xfe   :  { %v613_v60 = vadd.f32 %v1511_v33, %v612_v56  ;;  %v667_v61 = vmax.f32 %v493_v53, 0.0  ;;  %v699_v62 = vmax.f32 %v621_v54, 0.0  ;;  %v1288_v63 = vpop.f32.mrf.mxu0  ;;  %v1320_v0 = vpop.f32.mrf.mxu1 }
  0xff   :  { %985 = vst.msk [vmem:[%s1836_s3 + $0x60] sm:$0xf] %vm960_vm1, %v1183_v57  ;;  %1017 = vst.msk [vmem:[%s1836_s3 + $0xe0] sm:$0xf] %vm960_vm1, %v1215_v58  ;;  %v665_v1 = vmax.f32 %v485_v59, 0.0  ;;  %v506_v3 = vadd.f32 %v1288_v63, %v1511_v33  ;;  %v634_v4 = vadd.f32 %v1320_v0, %v1511_v33 }
 0x100   :  { %v697_v2 = vmax.f32 %v613_v60, 0.0  ;;  %v1186_v5 = vpack.c.bf16 %v667_v61, %v667_v61  ;;  %v1218_v6 = vpack.c.bf16 %v699_v62, %v699_v62  ;;  %v497_v7 = vpop.f32.mrf.mxu0  ;;  %v625_v8 = vpop.f32.mrf.mxu1 }
 0x101   :  { %v1184_v9 = vpack.c.bf16 %v665_v1, %v665_v1  ;;  %v670_v11 = vmax.f32 %v506_v3, 0.0  ;;  %v702_v12 = vmax.f32 %v634_v4, 0.0  ;;  %v498_v13 = vadd.f32 %v1511_v33, %v497_v7 }
 0x102   :  { %v1216_v10 = vpack.c.bf16 %v697_v2, %v697_v2  ;;  %988 = vst.msk [vmem:[%s1836_s3 + $0x6c] sm:$0xf] %vm960_vm1, %v1186_v5  ;;  %1020 = vst.msk [vmem:[%s1836_s3 + $0xec] sm:$0xf] %vm960_vm1, %v1218_v6  ;;  %v626_v14 = vadd.f32 %v1511_v33, %v625_v8  ;;  %v1289_v15 = vpop.f32.mrf.mxu0  ;;  %v1321_v16 = vpop.f32.mrf.mxu1 }
 0x103   :  { %986 = vst.msk [vmem:[%s1836_s3 + $0x64] sm:$0xf] %vm960_vm1, %v1184_v9  ;;  %v1189_v17 = vpack.c.bf16 %v670_v11, %v670_v11  ;;  %v1221_v18 = vpack.c.bf16 %v702_v12, %v702_v12  ;;  %v509_v19 = vadd.f32 %v1289_v15, %v1511_v33  ;;  %v637_v20 = vadd.f32 %v1321_v16, %v1511_v33 }
 0x104   :  { %1018 = vst.msk [vmem:[%s1836_s3 + $0xe4] sm:$0xf] %vm960_vm1, %v1216_v10  ;;  %v668_v21 = vmax.f32 %v498_v13, 0.0  ;;  %v700_v22 = vmax.f32 %v626_v14, 0.0  ;;  %v500_v23 = vpop.f32.mrf.mxu0  ;;  %v628_v24 = vpop.f32.mrf.mxu1 }
 0x105   :  { %991 = vst.msk [vmem:[%s1836_s3 + $0x78] sm:$0xf] %vm960_vm1, %v1189_v17  ;;  %1023 = vst.msk [vmem:[%s1836_s3 + $0xf8] sm:$0xf] %vm960_vm1, %v1221_v18  ;;  %v671_v25 = vmax.f32 %v509_v19, 0.0  ;;  %v703_v26 = vmax.f32 %v637_v20, 0.0  ;;  %v501_v27 = vadd.f32 %v1511_v33, %v500_v23  ;;  %v629_v28 = vadd.f32 %v1511_v33, %v628_v24 }
 0x106   :  { %v1187_v29 = vpack.c.bf16 %v668_v21, %v668_v21  ;;  %v1219_v30 = vpack.c.bf16 %v700_v22, %v700_v22 }
 0x107   :  { %v1190_v31 = vpack.c.bf16 %v671_v25, %v671_v25  ;;  %v1222_v32 = vpack.c.bf16 %v703_v26, %v703_v26  ;;  %v669_v34 = vmax.f32 %v501_v27, 0.0  ;;  %v701_v35 = vmax.f32 %v629_v28, 0.0 }
 0x108   :  { %989 = vst.msk [vmem:[%s1836_s3 + $0x70] sm:$0xf] %vm960_vm1, %v1187_v29  ;;  %1021 = vst.msk [vmem:[%s1836_s3 + $0xf0] sm:$0xf] %vm960_vm1, %v1219_v30 }
 0x109   :  { %992 = vst.msk [vmem:[%s1836_s3 + $0x7c] sm:$0xf] %vm960_vm1, %v1190_v31  ;;  %1024 = vst.msk [vmem:[%s1836_s3 + $0xfc] sm:$0xf] %vm960_vm1, %v1222_v32  ;;  %v1188_v33 = vpack.c.bf16 %v669_v34, %v669_v34  ;;  %v1220_v36 = vpack.c.bf16 %v701_v35, %v701_v35 }
 0x10b   :  { %990 = vst.msk [vmem:[%s1836_s3 + $0x74] sm:$0xf] %vm960_vm1, %v1188_v33  ;;  %1022 = vst.msk [vmem:[%s1836_s3 + $0xf4] sm:$0xf] %vm960_vm1, %v1220_v36 }

// kernel: _lambda_.6
= control target key start
LH: loop header
LB: loop body
LE: loop exit
PB: predicated region body
PF: predicated region fallthrough
CT: control target
= control target key end

     0   :  { %vm358_vm0 = vcmask 1044480   ;;  %vm359_vm1 = vcmask 1045504   ;;  %v995_v1 = vmov 65535   ;;  %vm261_vm2 = vcmask 220160   ;;  %s1475_s1 = inlined_call_operand.vmem [shape: bf16[27,16], index: 1, kind: input, shape index: {}]   ;;  %s1476_s0 = inlined_call_operand.vmem [shape: bf16[512,27], index: 0, kind: input, shape index: {}]   ;;  %s1477_s2 = inlined_call_operand.vmem [shape: f32[1,16], index: 2, kind: input, shape index: {}]   ;;  %s1478_s3 = inlined_call_operand.vmem [shape: f32[512,16], index: 3, kind: output, shape index: {}]  }
   0x1   :  { %v961_v0 = vld [vmem:[%s1475_s1 + $0x8] sm:$0x3f]   ;;  %v360_v2 = vsel %vm358_vm0, 4294967295, %v995_v1  ;;  %v963_v4 = vld [vmem:[%s1476_s0] sm:$0xff]   ;;  %v967_v10 = vld [vmem:[%s1476_s0 + $0x10] sm:$0xff]   ;;  %vm718_vm3 = vcmask 130048  }
   0x2   :  { %v361_v3 = vsel %vm359_vm1, %v360_v2, 0  ;;  %v962_v6 = vld [vmem:[%s1475_s1] sm:$0xff]   ;;  %892 = vmatprep.mubr.msk.bf16.mxu0 %vm261_vm2, %v963_v4  ;;  %v965_v8 = vld [vmem:[%s1476_s0 + $0x8] sm:$0xff]   ;;  %v968_v11 = vld [vmem:[%s1476_s0 + $0x90] sm:$0xff]  }
   0x3   :  { %v363_v5 = vand.u32 %v961_v0, %v361_v3  ;;  %v964_v7 = vld [vmem:[%s1476_s0 + $0x80] sm:$0xff]   ;;  %v966_v9 = vld [vmem:[%s1476_s0 + $0x88] sm:$0xff]   ;;  %v969_v12 = vld [vmem:[%s1476_s0 + $0x18] sm:$0xff]  }
   0x4   :  { %924 = vmatprep.mubr.msk.bf16.mxu1 %vm261_vm2, %v964_v7  ;;  %v970_v13 = vld [vmem:[%s1476_s0 + $0x98] sm:$0xff]   ;;  %v971_v14 = vld [vmem:[%s1476_s0 + $0x20] sm:$0xff]   ;;  %v973_v16 = vld [vmem:[%s1476_s0 + $0x28] sm:$0xff]  }
   0x5   :  { %888 = vmatprep.subr.bf16.mxu0 %v363_v5  ;;  %956 = vmatprep.subr.bf16.mxu1 %v363_v5  ;;  %v972_v15 = vld [vmem:[%s1476_s0 + $0xa0] sm:$0xff]   ;;  %v974_v17 = vld [vmem:[%s1476_s0 + $0xa8] sm:$0xff]   ;;  %v975_v18 = vld [vmem:[%s1476_s0 + $0x30] sm:$0xff]  }
   0x6   :  { %889 = vmatpush3.bf16.msra.mxu0 %v363_v5  ;;  %958 = vmatpush3.bf16.msra.mxu1 %v363_v5  ;;  %v976_v19 = vld [vmem:[%s1476_s0 + $0xb0] sm:$0xff]   ;;  %v977_v20 = vld [vmem:[%s1476_s0 + $0x38] sm:$0xff]   ;;  %v979_v22 = vld [vmem:[%s1476_s0 + $0x40] sm:$0xff]  }
   0x7   :  { %890 = vmatprep.subr.bf16.mxu0 %v962_v6  ;;  %957 = vmatprep.subr.bf16.mxu1 %v962_v6  ;;  %v978_v21 = vld [vmem:[%s1476_s0 + $0xb8] sm:$0xff]   ;;  %v980_v23 = vld [vmem:[%s1476_s0 + $0xc0] sm:$0xff]   ;;  %v981_v24 = vld [vmem:[%s1476_s0 + $0x48] sm:$0xff]  }
   0x8   :  { %v982_v25 = vld [vmem:[%s1476_s0 + $0xc8] sm:$0xff]   ;;  %v983_v26 = vld [vmem:[%s1476_s0 + $0x50] sm:$0xff]   ;;  %v985_v28 = vld [vmem:[%s1476_s0 + $0x58] sm:$0xff]  }
   0x9   :  { %v984_v27 = vld [vmem:[%s1476_s0 + $0xd0] sm:$0xff]   ;;  %v986_v29 = vld [vmem:[%s1476_s0 + $0xd8] sm:$0xff]   ;;  %v987_v30 = vld [vmem:[%s1476_s0 + $0x60] sm:$0xff]  }
   0xa   :  { %891 = vmatpush3.bf16.msra.mxu0 %v962_v6  ;;  %959 = vmatpush3.bf16.msra.mxu1 %v962_v6  ;;  %v988_v31 = vld [vmem:[%s1476_s0 + $0xe0] sm:$0xff]   ;;  %v989_v32 = vld [vmem:[%s1476_s0 + $0x68] sm:$0xff]   ;;  %v991_v34 = vld [vmem:[%s1476_s0 + $0x70] sm:$0xff]  }
   0xb   :  { %v990_v33 = vld [vmem:[%s1476_s0 + $0xe8] sm:$0xff]   ;;  %v992_v35 = vld [vmem:[%s1476_s0 + $0xf0] sm:$0xff]   ;;  %v993_v36 = vld [vmem:[%s1476_s0 + $0x78] sm:$0xff]  }
   0xc   :  { %v994_v37 = vld [vmem:[%s1476_s0 + $0xf8] sm:$0xff]   ;;  %v1153_v38 = vld [vmem:[%s1477_s2] ss:$0 sm:$0xff] }
   0xd   :  { %893 = vmatmul.mubr.msk.bf16.vlgmr.msra.gmra.mxu0 %vm261_vm2, %v965_v8  ;;  %925 = vmatmul.mubr.msk.bf16.vlgmr.msra.gmra.mxu1 %vm261_vm2, %v966_v9 }
   0xe   :  { %896 = vmatprep.mubr.msk.bf16.mxu0 %vm261_vm2, %v967_v10  ;;  %928 = vmatprep.mubr.msk.bf16.mxu1 %vm261_vm2, %v968_v11 }
  0x15   :  { %897 = vmatmul.mubr.msk.bf16.gmra.mxu0 %vm261_vm2, %v969_v12  ;;  %929 = vmatmul.mubr.msk.bf16.gmra.mxu1 %vm261_vm2, %v970_v13 }
  0x16   :  { %900 = vmatprep.mubr.msk.bf16.mxu0 %vm261_vm2, %v971_v14  ;;  %932 = vmatprep.mubr.msk.bf16.mxu1 %vm261_vm2, %v972_v15 }
  0x1d   :  { %901 = vmatmul.mubr.msk.bf16.gmra.mxu0 %vm261_vm2, %v973_v16  ;;  %933 = vmatmul.mubr.msk.bf16.gmra.mxu1 %vm261_vm2, %v974_v17 }
  0x1e   :  { %904 = vmatprep.mubr.msk.bf16.mxu0 %vm261_vm2, %v975_v18  ;;  %936 = vmatprep.mubr.msk.bf16.mxu1 %vm261_vm2, %v976_v19 }
  0x25   :  { %905 = vmatmul.mubr.msk.bf16.gmra.mxu0 %vm261_vm2, %v977_v20  ;;  %937 = vmatmul.mubr.msk.bf16.gmra.mxu1 %vm261_vm2, %v978_v21 }
  0x26   :  { %908 = vmatprep.mubr.msk.bf16.mxu0 %vm261_vm2, %v979_v22  ;;  %940 = vmatprep.mubr.msk.bf16.mxu1 %vm261_vm2, %v980_v23 }
  0x2d   :  { %909 = vmatmul.mubr.msk.bf16.gmra.mxu0 %vm261_vm2, %v981_v24  ;;  %941 = vmatmul.mubr.msk.bf16.gmra.mxu1 %vm261_vm2, %v982_v25 }
  0x2e   :  { %912 = vmatprep.mubr.msk.bf16.mxu0 %vm261_vm2, %v983_v26  ;;  %944 = vmatprep.mubr.msk.bf16.mxu1 %vm261_vm2, %v984_v27 }
  0x35   :  { %913 = vmatmul.mubr.msk.bf16.gmra.mxu0 %vm261_vm2, %v985_v28  ;;  %945 = vmatmul.mubr.msk.bf16.gmra.mxu1 %vm261_vm2, %v986_v29 }
  0x36   :  { %916 = vmatprep.mubr.msk.bf16.mxu0 %vm261_vm2, %v987_v30  ;;  %948 = vmatprep.mubr.msk.bf16.mxu1 %vm261_vm2, %v988_v31 }
  0x3d   :  { %917 = vmatmul.mubr.msk.bf16.gmra.mxu0 %vm261_vm2, %v989_v32  ;;  %949 = vmatmul.mubr.msk.bf16.gmra.mxu1 %vm261_vm2, %v990_v33 }
  0x3e   :  { %920 = vmatprep.mubr.msk.bf16.mxu0 %vm261_vm2, %v991_v34  ;;  %952 = vmatprep.mubr.msk.bf16.mxu1 %vm261_vm2, %v992_v35 }
  0x45   :  { %921 = vmatmul.mubr.msk.bf16.gmra.mxu0 %vm261_vm2, %v993_v36  ;;  %953 = vmatmul.mubr.msk.bf16.gmra.mxu1 %vm261_vm2, %v994_v37 }
  0xcd   :  { %v894_v39 = vpop.f32.mrf.mxu0  ;;  %v926_v40 = vpop.f32.mrf.mxu1 }
  0xce   :  { %v408_v41 = vadd.f32 %v894_v39, %v1153_v38  ;;  %v536_v42 = vadd.f32 %v926_v40, %v1153_v38 }
  0xcf   :  { %v399_v43 = vpop.f32.mrf.mxu0  ;;  %v527_v44 = vpop.f32.mrf.mxu1 }
  0xd0   :  { %v656_v45 = vmax.f32 %v408_v41, 0.0  ;;  %v688_v46 = vmax.f32 %v536_v42, 0.0  ;;  %v400_v47 = vadd.f32 %v1153_v38, %v399_v43  ;;  %v528_v48 = vadd.f32 %v1153_v38, %v527_v44 }
  0xd1   :  { %v895_v49 = vpop.f32.mrf.mxu0  ;;  %v927_v50 = vpop.f32.mrf.mxu1 }
  0xd2   :  { %721 = vst.msk [vmem:[%s1478_s3 + $0x10] sm:$0xff] %vm718_vm3, %v656_v45  ;;  %753 = vst.msk [vmem:[%s1478_s3 + $0x110] sm:$0xff] %vm718_vm3, %v688_v46  ;;  %v654_v51 = vmax.f32 %v400_v47, 0.0  ;;  %v686_v52 = vmax.f32 %v528_v48, 0.0  ;;  %v411_v53 = vadd.f32 %v895_v49, %v1153_v38  ;;  %v539_v54 = vadd.f32 %v927_v50, %v1153_v38 }
  0xd3   :  { %v402_v55 = vpop.f32.mrf.mxu0  ;;  %v530_v56 = vpop.f32.mrf.mxu1 }
  0xd4   :  { %719 = vst.msk [vmem:[%s1478_s3] sm:$0xff] %vm718_vm3, %v654_v51  ;;  %751 = vst.msk [vmem:[%s1478_s3 + $0x100] sm:$0xff] %vm718_vm3, %v686_v52  ;;  %v657_v57 = vmax.f32 %v411_v53, 0.0  ;;  %v689_v58 = vmax.f32 %v539_v54, 0.0  ;;  %v403_v59 = vadd.f32 %v1153_v38, %v402_v55  ;;  %v531_v60 = vadd.f32 %v1153_v38, %v530_v56 }
  0xd5   :  { %v898_v61 = vpop.f32.mrf.mxu0  ;;  %v930_v62 = vpop.f32.mrf.mxu1 }
  0xd6   :  { %722 = vst.msk [vmem:[%s1478_s3 + $0x18] sm:$0xff] %vm718_vm3, %v657_v57  ;;  %754 = vst.msk [vmem:[%s1478_s3 + $0x118] sm:$0xff] %vm718_vm3, %v689_v58  ;;  %v655_v63 = vmax.f32 %v403_v59, 0.0  ;;  %v687_v0 = vmax.f32 %v531_v60, 0.0  ;;  %v424_v1 = vadd.f32 %v898_v61, %v1153_v38  ;;  %v552_v2 = vadd.f32 %v930_v62, %v1153_v38 }
  0xd7   :  { %v415_v3 = vpop.f32.mrf.mxu0  ;;  %v543_v4 = vpop.f32.mrf.mxu1 }
  0xd8   :  { %720 = vst.msk [vmem:[%s1478_s3 + $0x8] sm:$0xff] %vm718_vm3, %v655_v63  ;;  %752 = vst.msk [vmem:[%s1478_s3 + $0x108] sm:$0xff] %vm718_vm3, %v687_v0  ;;  %v660_v5 = vmax.f32 %v424_v1, 0.0  ;;  %v692_v6 = vmax.f32 %v552_v2, 0.0  ;;  %v416_v7 = vadd.f32 %v1153_v38, %v415_v3  ;;  %v544_v8 = vadd.f32 %v1153_v38, %v543_v4 }
  0xd9   :  { %v899_v9 = vpop.f32.mrf.mxu0  ;;  %v931_v10 = vpop.f32.mrf.mxu1 }
  0xda   :  { %725 = vst.msk [vmem:[%s1478_s3 + $0x30] sm:$0xff] %vm718_vm3, %v660_v5  ;;  %757 = vst.msk [vmem:[%s1478_s3 + $0x130] sm:$0xff] %vm718_vm3, %v692_v6  ;;  %v658_v11 = vmax.f32 %v416_v7, 0.0  ;;  %v690_v12 = vmax.f32 %v544_v8, 0.0  ;;  %v427_v13 = vadd.f32 %v899_v9, %v1153_v38  ;;  %v555_v14 = vadd.f32 %v931_v10, %v1153_v38 }
  0xdb   :  { %v418_v15 = vpop.f32.mrf.mxu0  ;;  %v546_v16 = vpop.f32.mrf.mxu1 }
  0xdc   :  { %723 = vst.msk [vmem:[%s1478_s3 + $0x20] sm:$0xff] %vm718_vm3, %v658_v11  ;;  %755 = vst.msk [vmem:[%s1478_s3 + $0x120] sm:$0xff] %vm718_vm3, %v690_v12  ;;  %v661_v17 = vmax.f32 %v427_v13, 0.0  ;;  %v693_v18 = vmax.f32 %v555_v14, 0.0  ;;  %v419_v19 = vadd.f32 %v1153_v38, %v418_v15  ;;  %v547_v20 = vadd.f32 %v1153_v38, %v546_v16 }
  0xdd   :  { %v902_v21 = vpop.f32.mrf.mxu0  ;;  %v934_v22 = vpop.f32.mrf.mxu1 }
  0xde   :  { %726 = vst.msk [vmem:[%s1478_s3 + $0x38] sm:$0xff] %vm718_vm3, %v661_v17  ;;  %758 = vst.msk [vmem:[%s1478_s3 + $0x138] sm:$0xff] %vm718_vm3, %v693_v18  ;;  %v659_v23 = vmax.f32 %v419_v19, 0.0  ;;  %v691_v24 = vmax.f32 %v547_v20, 0.0  ;;  %v440_v25 = vadd.f32 %v902_v21, %v1153_v38  ;;  %v568_v26 = vadd.f32 %v934_v22, %v1153_v38 }
  0xdf   :  { %v431_v27 = vpop.f32.mrf.mxu0  ;;  %v559_v28 = vpop.f32.mrf.mxu1 }
  0xe0   :  { %724 = vst.msk [vmem:[%s1478_s3 + $0x28] sm:$0xff] %vm718_vm3, %v659_v23  ;;  %756 = vst.msk [vmem:[%s1478_s3 + $0x128] sm:$0xff] %vm718_vm3, %v691_v24  ;;  %v664_v29 = vmax.f32 %v440_v25, 0.0  ;;  %v696_v30 = vmax.f32 %v568_v26, 0.0  ;;  %v432_v31 = vadd.f32 %v1153_v38, %v431_v27  ;;  %v560_v32 = vadd.f32 %v1153_v38, %v559_v28 }
  0xe1   :  { %v903_v33 = vpop.f32.mrf.mxu0  ;;  %v935_v34 = vpop.f32.mrf.mxu1 }
  0xe2   :  { %729 = vst.msk [vmem:[%s1478_s3 + $0x50] sm:$0xff] %vm718_vm3, %v664_v29  ;;  %761 = vst.msk [vmem:[%s1478_s3 + $0x150] sm:$0xff] %vm718_vm3, %v696_v30  ;;  %v662_v35 = vmax.f32 %v432_v31, 0.0  ;;  %v694_v36 = vmax.f32 %v560_v32, 0.0  ;;  %v443_v37 = vadd.f32 %v903_v33, %v1153_v38  ;;  %v571_v39 = vadd.f32 %v935_v34, %v1153_v38 }
  0xe3   :  { %v434_v40 = vpop.f32.mrf.mxu0  ;;  %v562_v41 = vpop.f32.mrf.mxu1 }
  0xe4   :  { %727 = vst.msk [vmem:[%s1478_s3 + $0x40] sm:$0xff] %vm718_vm3, %v662_v35  ;;  %759 = vst.msk [vmem:[%s1478_s3 + $0x140] sm:$0xff] %vm718_vm3, %v694_v36  ;;  %v665_v42 = vmax.f32 %v443_v37, 0.0  ;;  %v697_v43 = vmax.f32 %v571_v39, 0.0  ;;  %v435_v44 = vadd.f32 %v1153_v38, %v434_v40  ;;  %v563_v45 = vadd.f32 %v1153_v38, %v562_v41 }
  0xe5   :  { %v906_v46 = vpop.f32.mrf.mxu0  ;;  %v938_v47 = vpop.f32.mrf.mxu1 }
  0xe6   :  { %730 = vst.msk [vmem:[%s1478_s3 + $0x58] sm:$0xff] %vm718_vm3, %v665_v42  ;;  %762 = vst.msk [vmem:[%s1478_s3 + $0x158] sm:$0xff] %vm718_vm3, %v697_v43  ;;  %v663_v48 = vmax.f32 %v435_v44, 0.0  ;;  %v695_v49 = vmax.f32 %v563_v45, 0.0  ;;  %v456_v50 = vadd.f32 %v906_v46, %v1153_v38  ;;  %v584_v51 = vadd.f32 %v938_v47, %v1153_v38 }
  0xe7   :  { %v447_v52 = vpop.f32.mrf.mxu0  ;;  %v575_v53 = vpop.f32.mrf.mxu1 }
  0xe8   :  { %728 = vst.msk [vmem:[%s1478_s3 + $0x48] sm:$0xff] %vm718_vm3, %v663_v48  ;;  %760 = vst.msk [vmem:[%s1478_s3 + $0x148] sm:$0xff] %vm718_vm3, %v695_v49  ;;  %v668_v54 = vmax.f32 %v456_v50, 0.0  ;;  %v700_v55 = vmax.f32 %v584_v51, 0.0  ;;  %v448_v56 = vadd.f32 %v1153_v38, %v447_v52  ;;  %v576_v57 = vadd.f32 %v1153_v38, %v575_v53 }
  0xe9   :  { %v907_v58 = vpop.f32.mrf.mxu0  ;;  %v939_v59 = vpop.f32.mrf.mxu1 }
  0xea   :  { %733 = vst.msk [vmem:[%s1478_s3 + $0x70] sm:$0xff] %vm718_vm3, %v668_v54  ;;  %765 = vst.msk [vmem:[%s1478_s3 + $0x170] sm:$0xff] %vm718_vm3, %v700_v55  ;;  %v666_v60 = vmax.f32 %v448_v56, 0.0  ;;  %v698_v61 = vmax.f32 %v576_v57, 0.0  ;;  %v459_v62 = vadd.f32 %v907_v58, %v1153_v38  ;;  %v587_v63 = vadd.f32 %v939_v59, %v1153_v38 }
  0xeb   :  { %v450_v0 = vpop.f32.mrf.mxu0  ;;  %v578_v1 = vpop.f32.mrf.mxu1 }
  0xec   :  { %731 = vst.msk [vmem:[%s1478_s3 + $0x60] sm:$0xff] %vm718_vm3, %v666_v60  ;;  %763 = vst.msk [vmem:[%s1478_s3 + $0x160] sm:$0xff] %vm718_vm3, %v698_v61  ;;  %v669_v2 = vmax.f32 %v459_v62, 0.0  ;;  %v701_v3 = vmax.f32 %v587_v63, 0.0  ;;  %v451_v4 = vadd.f32 %v1153_v38, %v450_v0  ;;  %v579_v5 = vadd.f32 %v1153_v38, %v578_v1 }
  0xed   :  { %v910_v6 = vpop.f32.mrf.mxu0  ;;  %v942_v7 = vpop.f32.mrf.mxu1 }
  0xee   :  { %734 = vst.msk [vmem:[%s1478_s3 + $0x78] sm:$0xff] %vm718_vm3, %v669_v2  ;;  %766 = vst.msk [vmem:[%s1478_s3 + $0x178] sm:$0xff] %vm718_vm3, %v701_v3  ;;  %v667_v8 = vmax.f32 %v451_v4, 0.0  ;;  %v699_v9 = vmax.f32 %v579_v5, 0.0  ;;  %v472_v10 = vadd.f32 %v910_v6, %v1153_v38  ;;  %v600_v11 = vadd.f32 %v942_v7, %v1153_v38 }
  0xef   :  { %v463_v12 = vpop.f32.mrf.mxu0  ;;  %v591_v13 = vpop.f32.mrf.mxu1 }
  0xf0   :  { %732 = vst.msk [vmem:[%s1478_s3 + $0x68] sm:$0xff] %vm718_vm3, %v667_v8  ;;  %764 = vst.msk [vmem:[%s1478_s3 + $0x168] sm:$0xff] %vm718_vm3, %v699_v9  ;;  %v672_v14 = vmax.f32 %v472_v10, 0.0  ;;  %v704_v15 = vmax.f32 %v600_v11, 0.0  ;;  %v464_v16 = vadd.f32 %v1153_v38, %v463_v12  ;;  %v592_v17 = vadd.f32 %v1153_v38, %v591_v13 }
  0xf1   :  { %v911_v18 = vpop.f32.mrf.mxu0  ;;  %v943_v19 = vpop.f32.mrf.mxu1 }
  0xf2   :  { %737 = vst.msk [vmem:[%s1478_s3 + $0x90] sm:$0xff] %vm718_vm3, %v672_v14  ;;  %769 = vst.msk [vmem:[%s1478_s3 + $0x190] sm:$0xff] %vm718_vm3, %v704_v15  ;;  %v670_v20 = vmax.f32 %v464_v16, 0.0  ;;  %v702_v21 = vmax.f32 %v592_v17, 0.0  ;;  %v475_v22 = vadd.f32 %v911_v18, %v1153_v38  ;;  %v603_v23 = vadd.f32 %v943_v19, %v1153_v38 }
  0xf3   :  { %v466_v24 = vpop.f32.mrf.mxu0  ;;  %v594_v25 = vpop.f32.mrf.mxu1 }
  0xf4   :  { %735 = vst.msk [vmem:[%s1478_s3 + $0x80] sm:$0xff] %vm718_vm3, %v670_v20  ;;  %767 = vst.msk [vmem:[%s1478_s3 + $0x180] sm:$0xff] %vm718_vm3, %v702_v21  ;;  %v673_v26 = vmax.f32 %v475_v22, 0.0  ;;  %v705_v27 = vmax.f32 %v603_v23, 0.0  ;;  %v467_v28 = vadd.f32 %v1153_v38, %v466_v24  ;;  %v595_v29 = vadd.f32 %v1153_v38, %v594_v25 }
  0xf5   :  { %v914_v30 = vpop.f32.mrf.mxu0  ;;  %v946_v31 = vpop.f32.mrf.mxu1 }
  0xf6   :  { %738 = vst.msk [vmem:[%s1478_s3 + $0x98] sm:$0xff] %vm718_vm3, %v673_v26  ;;  %770 = vst.msk [vmem:[%s1478_s3 + $0x198] sm:$0xff] %vm718_vm3, %v705_v27  ;;  %v671_v32 = vmax.f32 %v467_v28, 0.0  ;;  %v703_v33 = vmax.f32 %v595_v29, 0.0  ;;  %v488_v34 = vadd.f32 %v914_v30, %v1153_v38  ;;  %v616_v35 = vadd.f32 %v946_v31, %v1153_v38 }
  0xf7   :  { %v479_v36 = vpop.f32.mrf.mxu0  ;;  %v607_v37 = vpop.f32.mrf.mxu1 }
  0xf8   :  { %736 = vst.msk [vmem:[%s1478_s3 + $0x88] sm:$0xff] %vm718_vm3, %v671_v32  ;;  %768 = vst.msk [vmem:[%s1478_s3 + $0x188] sm:$0xff] %vm718_vm3, %v703_v33  ;;  %v676_v39 = vmax.f32 %v488_v34, 0.0  ;;  %v708_v40 = vmax.f32 %v616_v35, 0.0  ;;  %v480_v41 = vadd.f32 %v1153_v38, %v479_v36  ;;  %v608_v42 = vadd.f32 %v1153_v38, %v607_v37 }
  0xf9   :  { %v915_v43 = vpop.f32.mrf.mxu0  ;;  %v947_v44 = vpop.f32.mrf.mxu1 }
  0xfa   :  { %741 = vst.msk [vmem:[%s1478_s3 + $0xb0] sm:$0xff] %vm718_vm3, %v676_v39  ;;  %773 = vst.msk [vmem:[%s1478_s3 + $0x1b0] sm:$0xff] %vm718_vm3, %v708_v40  ;;  %v674_v45 = vmax.f32 %v480_v41, 0.0  ;;  %v706_v46 = vmax.f32 %v608_v42, 0.0  ;;  %v491_v47 = vadd.f32 %v915_v43, %v1153_v38  ;;  %v619_v48 = vadd.f32 %v947_v44, %v1153_v38 }
  0xfb   :  { %v482_v49 = vpop.f32.mrf.mxu0  ;;  %v610_v50 = vpop.f32.mrf.mxu1 }
  0xfc   :  { %739 = vst.msk [vmem:[%s1478_s3 + $0xa0] sm:$0xff] %vm718_vm3, %v674_v45  ;;  %771 = vst.msk [vmem:[%s1478_s3 + $0x1a0] sm:$0xff] %vm718_vm3, %v706_v46  ;;  %v677_v51 = vmax.f32 %v491_v47, 0.0  ;;  %v709_v52 = vmax.f32 %v619_v48, 0.0  ;;  %v483_v53 = vadd.f32 %v1153_v38, %v482_v49  ;;  %v611_v54 = vadd.f32 %v1153_v38, %v610_v50 }
  0xfd   :  { %v918_v55 = vpop.f32.mrf.mxu0  ;;  %v950_v56 = vpop.f32.mrf.mxu1 }
  0xfe   :  { %742 = vst.msk [vmem:[%s1478_s3 + $0xb8] sm:$0xff] %vm718_vm3, %v677_v51  ;;  %774 = vst.msk [vmem:[%s1478_s3 + $0x1b8] sm:$0xff] %vm718_vm3, %v709_v52  ;;  %v675_v57 = vmax.f32 %v483_v53, 0.0  ;;  %v707_v58 = vmax.f32 %v611_v54, 0.0  ;;  %v504_v59 = vadd.f32 %v918_v55, %v1153_v38  ;;  %v632_v60 = vadd.f32 %v950_v56, %v1153_v38 }
  0xff   :  { %v495_v61 = vpop.f32.mrf.mxu0  ;;  %v623_v62 = vpop.f32.mrf.mxu1 }
 0x100   :  { %740 = vst.msk [vmem:[%s1478_s3 + $0xa8] sm:$0xff] %vm718_vm3, %v675_v57  ;;  %772 = vst.msk [vmem:[%s1478_s3 + $0x1a8] sm:$0xff] %vm718_vm3, %v707_v58  ;;  %v680_v63 = vmax.f32 %v504_v59, 0.0  ;;  %v712_v0 = vmax.f32 %v632_v60, 0.0  ;;  %v496_v1 = vadd.f32 %v1153_v38, %v495_v61  ;;  %v624_v2 = vadd.f32 %v1153_v38, %v623_v62 }
 0x101   :  { %v919_v3 = vpop.f32.mrf.mxu0  ;;  %v951_v4 = vpop.f32.mrf.mxu1 }
 0x102   :  { %745 = vst.msk [vmem:[%s1478_s3 + $0xd0] sm:$0xff] %vm718_vm3, %v680_v63  ;;  %777 = vst.msk [vmem:[%s1478_s3 + $0x1d0] sm:$0xff] %vm718_vm3, %v712_v0  ;;  %v678_v5 = vmax.f32 %v496_v1, 0.0  ;;  %v710_v6 = vmax.f32 %v624_v2, 0.0  ;;  %v507_v7 = vadd.f32 %v919_v3, %v1153_v38  ;;  %v635_v8 = vadd.f32 %v951_v4, %v1153_v38 }
 0x103   :  { %v498_v9 = vpop.f32.mrf.mxu0  ;;  %v626_v10 = vpop.f32.mrf.mxu1 }
 0x104   :  { %743 = vst.msk [vmem:[%s1478_s3 + $0xc0] sm:$0xff] %vm718_vm3, %v678_v5  ;;  %775 = vst.msk [vmem:[%s1478_s3 + $0x1c0] sm:$0xff] %vm718_vm3, %v710_v6  ;;  %v681_v11 = vmax.f32 %v507_v7, 0.0  ;;  %v713_v12 = vmax.f32 %v635_v8, 0.0  ;;  %v499_v13 = vadd.f32 %v1153_v38, %v498_v9  ;;  %v627_v14 = vadd.f32 %v1153_v38, %v626_v10 }
 0x105   :  { %v922_v15 = vpop.f32.mrf.mxu0  ;;  %v954_v16 = vpop.f32.mrf.mxu1 }
 0x106   :  { %746 = vst.msk [vmem:[%s1478_s3 + $0xd8] sm:$0xff] %vm718_vm3, %v681_v11  ;;  %778 = vst.msk [vmem:[%s1478_s3 + $0x1d8] sm:$0xff] %vm718_vm3, %v713_v12  ;;  %v679_v17 = vmax.f32 %v499_v13, 0.0  ;;  %v711_v18 = vmax.f32 %v627_v14, 0.0  ;;  %v520_v19 = vadd.f32 %v922_v15, %v1153_v38  ;;  %v648_v20 = vadd.f32 %v954_v16, %v1153_v38 }
 0x107   :  { %v511_v21 = vpop.f32.mrf.mxu0  ;;  %v639_v22 = vpop.f32.mrf.mxu1 }
 0x108   :  { %744 = vst.msk [vmem:[%s1478_s3 + $0xc8] sm:$0xff] %vm718_vm3, %v679_v17  ;;  %776 = vst.msk [vmem:[%s1478_s3 + $0x1c8] sm:$0xff] %vm718_vm3, %v711_v18  ;;  %v684_v23 = vmax.f32 %v520_v19, 0.0  ;;  %v716_v24 = vmax.f32 %v648_v20, 0.0  ;;  %v512_v25 = vadd.f32 %v1153_v38, %v511_v21  ;;  %v640_v26 = vadd.f32 %v1153_v38, %v639_v22 }
 0x109   :  { %v923_v27 = vpop.f32.mrf.mxu0  ;;  %v955_v28 = vpop.f32.mrf.mxu1 }
 0x10a   :  { %749 = vst.msk [vmem:[%s1478_s3 + $0xf0] sm:$0xff] %vm718_vm3, %v684_v23  ;;  %781 = vst.msk [vmem:[%s1478_s3 + $0x1f0] sm:$0xff] %vm718_vm3, %v716_v24  ;;  %v682_v29 = vmax.f32 %v512_v25, 0.0  ;;  %v714_v30 = vmax.f32 %v640_v26, 0.0  ;;  %v523_v31 = vadd.f32 %v923_v27, %v1153_v38  ;;  %v651_v32 = vadd.f32 %v955_v28, %v1153_v38 }
 0x10b   :  { %v514_v33 = vpop.f32.mrf.mxu0  ;;  %v642_v34 = vpop.f32.mrf.mxu1 }
 0x10c   :  { %747 = vst.msk [vmem:[%s1478_s3 + $0xe0] sm:$0xff] %vm718_vm3, %v682_v29  ;;  %779 = vst.msk [vmem:[%s1478_s3 + $0x1e0] sm:$0xff] %vm718_vm3, %v714_v30  ;;  %v685_v35 = vmax.f32 %v523_v31, 0.0  ;;  %v717_v36 = vmax.f32 %v651_v32, 0.0  ;;  %v515_v37 = vadd.f32 %v1153_v38, %v514_v33  ;;  %v643_v39 = vadd.f32 %v1153_v38, %v642_v34 }
 0x10e   :  { %750 = vst.msk [vmem:[%s1478_s3 + $0xf8] sm:$0xff] %vm718_vm3, %v685_v35  ;;  %782 = vst.msk [vmem:[%s1478_s3 + $0x1f8] sm:$0xff] %vm718_vm3, %v717_v36  ;;  %v683_v40 = vmax.f32 %v515_v37, 0.0  ;;  %v715_v41 = vmax.f32 %v643_v39, 0.0 }
 0x110   :  { %748 = vst.msk [vmem:[%s1478_s3 + $0xe8] sm:$0xff] %vm718_vm3, %v683_v40  ;;  %780 = vst.msk [vmem:[%s1478_s3 + $0x1e8] sm:$0xff] %vm718_vm3, %v715_v41 }

// kernel: _lambda_.9
= control target key start
LH: loop header
LB: loop body
LE: loop exit
PB: predicated region body
PF: predicated region fallthrough
CT: control target
= control target key end

     0   :  { %vm115_vm0 = vcmask 1043456   ;;  %vm90_vm1 = vcmask 195584   ;;  %vm296_vm2 = vcmask 257024   ;;  %s557_s1 = inlined_call_operand.vmem [shape: bf16[24,32], index: 1, kind: input, shape index: {}]   ;;  %s558_s0 = inlined_call_operand.vmem [shape: bf16[128,24], index: 0, kind: input, shape index: {}]   ;;  %s559_s2 = inlined_call_operand.vmem [shape: f32[1,32], index: 2, kind: input, shape index: {}]   ;;  %s560_s3 = inlined_call_operand.vmem [shape: bf16[128,32], index: 3, kind: output, shape index: {}]  }
   0x1   :  { %v404_v0 = vld [vmem:[%s557_s1 + $0x8] ss:$0 sps:$4 sm:$0xff]   ;;  %v405_v1 = vld [vmem:[%s557_s1] sm:$0xff]   ;;  %v410_v7 = vld [vmem:[%s558_s0 + $0x10] sm:$0xff]  }
   0x2   :  { %402 = vmatprep.subr.msk.bf16.mxu0 %vm115_vm0, %v404_v0  ;;  %403 = vmatprep.subr.msk.bf16.mxu1 %vm115_vm0, %v404_v0  ;;  %v117_v2 = vsel %vm115_vm0, %v404_v0, 0  ;;  %v406_v3 = vld [vmem:[%s558_s0] sm:$0xff]   ;;  %v408_v5 = vld [vmem:[%s558_s0 + $0x8] sm:$0xff]   ;;  %v411_v8 = vld [vmem:[%s558_s0 + $0x30] sm:$0xff]  }
   0x3   :  { %379 = vmatpush3.bf16.msra.mxu0 %v117_v2  ;;  %400 = vmatpush3.bf16.msra.mxu1 %v117_v2  ;;  %v407_v4 = vld [vmem:[%s558_s0 + $0x20] sm:$0xff]   ;;  %v409_v6 = vld [vmem:[%s558_s0 + $0x28] sm:$0xff]   ;;  %v412_v9 = vld [vmem:[%s558_s0 + $0x18] sm:$0xff]  }
   0x4   :  { %380 = vmatprep.subr.bf16.mxu0 %v405_v1  ;;  %399 = vmatprep.subr.bf16.mxu1 %v405_v1  ;;  %v413_v10 = vld [vmem:[%s558_s0 + $0x38] sm:$0xff]   ;;  %v475_v11 = vld [vmem:[%s559_s2] ss:$0 sm:$0xff] }
   0x5   :  { %382 = vmatprep.mubr.msk.bf16.mxu0 %vm90_vm1, %v406_v3  ;;  %390 = vmatprep.mubr.msk.bf16.mxu1 %vm90_vm1, %v407_v4 }
   0x7   :  { %381 = vmatpush3.bf16.msra.mxu0 %v405_v1  ;;  %401 = vmatpush3.bf16.msra.mxu1 %v405_v1 }
   0xa   :  { %383 = vmatmul.mubr.msk.bf16.vlgmr.msra.gmra.mxu0 %vm90_vm1, %v408_v5  ;;  %391 = vmatmul.mubr.msk.bf16.vlgmr.msra.gmra.mxu1 %vm90_vm1, %v409_v6 }
   0xb   :  { %386 = vmatprep.mubr.msk.bf16.mxu0 %vm90_vm1, %v410_v7  ;;  %394 = vmatprep.mubr.msk.bf16.mxu1 %vm90_vm1, %v411_v8 }
  0x12   :  { %387 = vmatmul.mubr.msk.bf16.gmra.mxu0 %vm90_vm1, %v412_v9  ;;  %395 = vmatmul.mubr.msk.bf16.gmra.mxu1 %vm90_vm1, %v413_v10 }
  0xca   :  { %v384_v12 = vpop.f32.mrf.mxu0  ;;  %v392_v13 = vpop.f32.mrf.mxu1 }
  0xcb   :  { %v162_v14 = vadd.f32 %v384_v12, %v475_v11  ;;  %v194_v15 = vadd.f32 %v392_v13, %v475_v11 }
  0xcc   :  { %v153_v16 = vpop.f32.mrf.mxu0  ;;  %v185_v17 = vpop.f32.mrf.mxu1 }
  0xcd   :  { %v218_v18 = vmax.f32 %v162_v14, 0.0  ;;  %v226_v19 = vmax.f32 %v194_v15, 0.0  ;;  %v154_v20 = vadd.f32 %v475_v11, %v153_v16  ;;  %v186_v21 = vadd.f32 %v475_v11, %v185_v17 }
  0xce   :  { %v385_v22 = vpop.f32.mrf.mxu0  ;;  %v393_v23 = vpop.f32.mrf.mxu1 }
  0xcf   :  { %v354_v24 = vpack.c.bf16 %v218_v18, %v218_v18  ;;  %v362_v25 = vpack.c.bf16 %v226_v19, %v226_v19  ;;  %v216_v26 = vmax.f32 %v154_v20, 0.0  ;;  %v224_v27 = vmax.f32 %v186_v21, 0.0 }
  0xd0   :  { %v165_v28 = vadd.f32 %v385_v22, %v475_v11  ;;  %v197_v29 = vadd.f32 %v393_v23, %v475_v11  ;;  %v156_v30 = vpop.f32.mrf.mxu0  ;;  %v188_v31 = vpop.f32.mrf.mxu1 }
  0xd1   :  { %299 = vst.msk [vmem:[%s560_s3 + $0x8] sm:$0xf] %vm296_vm2, %v354_v24  ;;  %307 = vst.msk [vmem:[%s560_s3 + $0x28] sm:$0xf] %vm296_vm2, %v362_v25  ;;  %v352_v32 = vpack.c.bf16 %v216_v26, %v216_v26  ;;  %v360_v33 = vpack.c.bf16 %v224_v27, %v224_v27  ;;  %v157_v34 = vadd.f32 %v475_v11, %v156_v30 }
  0xd2   :  { %v189_v35 = vadd.f32 %v475_v11, %v188_v31  ;;  %v219_v36 = vmax.f32 %v165_v28, 0.0  ;;  %v227_v37 = vmax.f32 %v197_v29, 0.0  ;;  %v388_v38 = vpop.f32.mrf.mxu0  ;;  %v396_v39 = vpop.f32.mrf.mxu1 }
  0xd3   :  { %297 = vst.msk [vmem:[%s560_s3] sm:$0xf] %vm296_vm2, %v352_v32  ;;  %305 = vst.msk [vmem:[%s560_s3 + $0x20] sm:$0xf] %vm296_vm2, %v360_v33  ;;  %v217_v40 = vmax.f32 %v157_v34, 0.0  ;;  %v178_v42 = vadd.f32 %v388_v38, %v475_v11  ;;  %v210_v43 = vadd.f32 %v396_v39, %v475_v11 }
  0xd4   :  { %v225_v41 = vmax.f32 %v189_v35, 0.0  ;;  %v355_v44 = vpack.c.bf16 %v219_v36, %v219_v36  ;;  %v363_v45 = vpack.c.bf16 %v227_v37, %v227_v37  ;;  %v169_v46 = vpop.f32.mrf.mxu0  ;;  %v201_v47 = vpop.f32.mrf.mxu1 }
  0xd5   :  { %v353_v48 = vpack.c.bf16 %v217_v40, %v217_v40  ;;  %v222_v50 = vmax.f32 %v178_v42, 0.0  ;;  %v230_v51 = vmax.f32 %v210_v43, 0.0  ;;  %v170_v52 = vadd.f32 %v475_v11, %v169_v46 }
  0xd6   :  { %v361_v49 = vpack.c.bf16 %v225_v41, %v225_v41  ;;  %300 = vst.msk [vmem:[%s560_s3 + $0xc] sm:$0xf] %vm296_vm2, %v355_v44  ;;  %308 = vst.msk [vmem:[%s560_s3 + $0x2c] sm:$0xf] %vm296_vm2, %v363_v45  ;;  %v202_v53 = vadd.f32 %v475_v11, %v201_v47  ;;  %v389_v54 = vpop.f32.mrf.mxu0  ;;  %v397_v55 = vpop.f32.mrf.mxu1 }
  0xd7   :  { %298 = vst.msk [vmem:[%s560_s3 + $0x4] sm:$0xf] %vm296_vm2, %v353_v48  ;;  %v358_v56 = vpack.c.bf16 %v222_v50, %v222_v50  ;;  %v366_v57 = vpack.c.bf16 %v230_v51, %v230_v51  ;;  %v181_v58 = vadd.f32 %v389_v54, %v475_v11  ;;  %v213_v59 = vadd.f32 %v397_v55, %v475_v11 }
  0xd8   :  { %306 = vst.msk [vmem:[%s560_s3 + $0x24] sm:$0xf] %vm296_vm2, %v361_v49  ;;  %v220_v60 = vmax.f32 %v170_v52, 0.0  ;;  %v228_v61 = vmax.f32 %v202_v53, 0.0  ;;  %v172_v62 = vpop.f32.mrf.mxu0  ;;  %v204_v63 = vpop.f32.mrf.mxu1 }
  0xd9   :  { %303 = vst.msk [vmem:[%s560_s3 + $0x18] sm:$0xf] %vm296_vm2, %v358_v56  ;;  %311 = vst.msk [vmem:[%s560_s3 + $0x38] sm:$0xf] %vm296_vm2, %v366_v57  ;;  %v223_v0 = vmax.f32 %v181_v58, 0.0  ;;  %v231_v1 = vmax.f32 %v213_v59, 0.0  ;;  %v173_v2 = vadd.f32 %v475_v11, %v172_v62  ;;  %v205_v3 = vadd.f32 %v475_v11, %v204_v63 }
  0xda   :  { %v356_v4 = vpack.c.bf16 %v220_v60, %v220_v60  ;;  %v364_v5 = vpack.c.bf16 %v228_v61, %v228_v61 }
  0xdb   :  { %v359_v6 = vpack.c.bf16 %v223_v0, %v223_v0  ;;  %v367_v7 = vpack.c.bf16 %v231_v1, %v231_v1  ;;  %v221_v8 = vmax.f32 %v173_v2, 0.0  ;;  %v229_v9 = vmax.f32 %v205_v3, 0.0 }
  0xdc   :  { %301 = vst.msk [vmem:[%s560_s3 + $0x10] sm:$0xf] %vm296_vm2, %v356_v4  ;;  %309 = vst.msk [vmem:[%s560_s3 + $0x30] sm:$0xf] %vm296_vm2, %v364_v5 }
  0xdd   :  { %304 = vst.msk [vmem:[%s560_s3 + $0x1c] sm:$0xf] %vm296_vm2, %v359_v6  ;;  %312 = vst.msk [vmem:[%s560_s3 + $0x3c] sm:$0xf] %vm296_vm2, %v367_v7  ;;  %v357_v10 = vpack.c.bf16 %v221_v8, %v221_v8  ;;  %v365_v11 = vpack.c.bf16 %v229_v9, %v229_v9 }
  0xdf   :  { %302 = vst.msk [vmem:[%s560_s3 + $0x14] sm:$0xf] %vm296_vm2, %v357_v10  ;;  %310 = vst.msk [vmem:[%s560_s3 + $0x34] sm:$0xf] %vm296_vm2, %v365_v11 }

// kernel: _lambda_.8
= control target key start
LH: loop header
LB: loop body
LE: loop exit
PB: predicated region body
PF: predicated region fallthrough
CT: control target
= control target key end

     0   :  { %s1404_s21 = smov 0   ;;  %s1625_s0 = inlined_call_operand.vmem [shape: bf16[128,216], index: 0, kind: input, shape index: {}]   ;;  %s1626_s1 = inlined_call_operand.vmem [shape: bf16[216,24], index: 1, kind: input, shape index: {}]   ;;  %s1627_s2 = inlined_call_operand.vmem [shape: f32[1,24], index: 2, kind: input, shape index: {}]   ;;  %s1628_s3 = inlined_call_operand.vmem [shape: bf16[24,4], index: 3, kind: input, shape index: {}]   ;;  %s1629_s4 = inlined_call_operand.vmem [shape: f32[1,4], index: 4, kind: input, shape index: {}]   ;;  %s1630_s5 = inlined_call_operand.vmem [shape: bf16[4,24], index: 5, kind: input, shape index: {}]   ;;  %s1631_s6 = inlined_call_operand.vmem [shape: f32[1,24], index: 6, kind: input, shape index: {}]   ;;  %s1632_s7 = inlined_call_operand.vmem [shape: bf16[24,24], index: 7, kind: input, shape index: {}]   ;;  %s1633_s8 = inlined_call_operand.vmem [shape: f32[1,24], index: 8, kind: input, shape index: {}]   ;;  %s1634_s9 = inlined_call_operand.vmem [shape: bf16[128,16], index: 9, kind: input, shape index: {}]   ;;  %s1635_s10 = inlined_call_operand.vmem [shape: bf16[16,24], index: 10, kind: input, shape index: {}]   ;;  %s1636_s11 = inlined_call_operand.vmem [shape: f32[1,24], index: 11, kind: input, shape index: {}]   ;;  %s1637_s12 = inlined_call_operand.vmem [shape: f32[128,24], index: 12, kind: output, shape index: {}]  }
   0x1 LB: > { %s1162_s22 = sadd.s32 4294967295, %s1334_s21   ;;  %p1166_p0 = scmp.ge.s32.totalorder %s1334_s21, 1  ;;  %s1334_s21 = sphi %s1404_s21, %s22_s21  }
   0x2   : > { %p375_p1 = scmp.lt.s32.totalorder %s1334_s21, 3 }
   0x4   : > { %p376_p2 = pnand %p1166_p0, %p375_p1 }
   0x5   : > { %s1167_s27 = sshll.u32 (!%p376_p2), %s1162_s22, 3 }
   0x6   : > { %379 = sbr.rel (%p376_p2) target bundleno = 977 (0x3d1), region = 68  ;;  %p424_p3 = scmp.lt.s32.totalorder (!%p376_p2), %s1167_s27, 15 }
   0xb   : > { %v1289_v0 = vld [vmem:[%s1626_s1 + $0x38] sm:$0xff]   ;;  %v1336_v1 = vmov 0   ;;  %v1290_v2 = vld [vmem:[%s1626_s1 + $0x30] sm:$0xff]   ;;  %s1639_s27 = smov (!%p424_p3, %s1167_s27), 15  ;;  %v1291_v3 = vld [vmem:[%s1626_s1 + $0x28] sm:$0xff]   ;;  %vm602_vm0 = vcmask 719872  }
   0xc   : > { %619 = vmatprep.subr.bf16.mxu0 %v1336_v1  ;;  %s1224_s30 = sshll.u32 %s1639_s27, 3  ;;  %v1292_v4 = vld [vmem:[%s1626_s1 + $0x20] sm:$0xff]   ;;  %v1293_v5 = vld [vmem:[%s1626_s1 + $0x18] sm:$0xff]   ;;  %v1294_v7 = vld [vmem:[%s1626_s1 + $0x10] sm:$0xff]   ;;  %s1171_s23 = sshll.u32 %s1639_s27, 2  ;;  %vm615_vm1 = vcmask 1043456  }
   0xd   : > { %620 = vmatpush1.bf16.msra.mxu0 %v1289_v0  ;;  %s1432_s17 = scalar_lea.vmem %s1625_s0, %s1224_s30  ;;  %v1295_v8 = vld [vmem:[%s1626_s1 + $0x8] sm:$0xff]   ;;  %s1449_s29 = scalar_lea.vmem %s1634_s9, %s1171_s23  ;;  %v1296_v9 = vld [vmem:[%s1626_s1] sm:$0xff]   ;;  %v1299_v13 = vld [vmem:[%s1626_s1 + $0x58] sm:$0xff]   ;;  %v1337_v25 = vmov 0.0   ;;  %vm1338_vm2 = vmmov 0   ;;  %vm692_vm3 = vcmask 195584  }
   0xe   : > { %621 = vmatprep.subr.bf16.mxu0 %v1336_v1  ;;  %v1305_v6 = vld [vmem:[%s1432_s17 + $0x4] ss:$8 sps:$4 sm:$0xff]   ;;  %v1297_v10 = vld [vmem:[%s1626_s1 + $0x68] ss:$0 sps:$4 sm:$0xff]   ;;  %v1300_v14 = vld [vmem:[%s1626_s1 + $0x50] sm:$0xff]   ;;  %1241 = vmatprep.subr.bf16.mxu1 %v1337_v25  ;;  %vm784_vm4 = vcmask 1041408   ;;  %s1604_s24 = scalar_lea.vmem %s1637_s12, %s1224_s30 }
   0xf   : > { %1197 = vmatprep.mubr.msk.bf16.mxu0 %vm602_vm0, %v1305_v6  ;;  %v617_v11 = vsel %vm615_vm1, %v1297_v10, 0  ;;  %v1298_v12 = vld [vmem:[%s1626_s1 + $0x60] sm:$0xff]   ;;  %v1301_v15 = vld [vmem:[%s1626_s1 + $0x48] sm:$0xff]   ;;  %v1306_v18 = vld [vmem:[%s1432_s17 + $0x14] ss:$8 sps:$4 sm:$0xff]   ;;  %1245 = vmatprep.mubr.msk.bf16.mxu1 %vm1338_vm2, %v1337_v25  ;;  %vm780_vm5 = vcmask 31744  }
  0x10   : > { %v1302_v16 = vld [vmem:[%s1626_s1 + $0x40] sm:$0xff]   ;;  %v1308_v19 = vld [vmem:[%s1432_s17 + $0x10] ss:$8 sps:$4 sm:$0xff]   ;;  %v1312_v22 = vld [vmem:[%s1432_s17 + $0x34] ss:$8 sps:$4 sm:$0xff]   ;;  %vm992_vm6 = vcmask 130048  }
  0x11   : > { %622 = vmatpush1.bf16.msra.mxu0 %v1290_v2  ;;  %v1303_v17 = vld [vmem:[%s1432_s17] ss:$8 sps:$4 sm:$0xff]   ;;  %v1309_v20 = vld [vmem:[%s1432_s17 + $0x24] ss:$8 sps:$4 sm:$0xff]   ;;  %v1314_v23 = vld [vmem:[%s1432_s17 + $0x30] ss:$8 sps:$4 sm:$0xff]  }
  0x12   : > { %623 = vmatprep.subr.bf16.mxu0 %v1336_v1  ;;  %v1311_v21 = vld [vmem:[%s1432_s17 + $0x20] ss:$8 sps:$4 sm:$0xff]  }
  0x13   : > { %v1315_v24 = vld [vmem:[%s1628_s3 + $0x8] ss:$0 sps:$4 sm:$0xff]   ;;  %v1316_v27 = vld [vmem:[%s1628_s3] sm:$0xff]  }
  0x14   : > { %v734_v26 = vsel %vm615_vm1, %v1315_v24, 0  ;;  %v1174_v33 = vld [vmem:[%s1627_s2] ss:$0 sm:$0xff] }
  0x15   : > { %624 = vmatpush1.bf16.msra.mxu0 %v1291_v3  ;;  %1242 = vmatpush3.bf16.msra.mxu1 %v734_v26 }
  0x16   : > { %625 = vmatprep.subr.bf16.mxu0 %v1336_v1  ;;  %1243 = vmatprep.subr.bf16.mxu1 %v1337_v25 }
  0x19   : > { %626 = vmatpush1.bf16.msra.mxu0 %v1292_v4  ;;  %1244 = vmatpush3.bf16.msra.mxu1 %v1316_v27 }
  0x1a   : > { %627 = vmatprep.subr.bf16.mxu0 %v1336_v1  ;;  %1249 = vmatprep.subr.bf16.mxu1 %v1337_v25 }
  0x1d   : > { %628 = vmatpush1.bf16.msra.mxu0 %v1293_v5 }
  0x1e   : > { %629 = vmatprep.subr.bf16.mxu0 %v1336_v1 }
  0x21   : > { %630 = vmatpush1.bf16.msra.mxu0 %v1294_v7 }
  0x22   : > { %631 = vmatprep.subr.bf16.mxu0 %v1336_v1 }
  0x25   : > { %632 = vmatpush1.bf16.msra.mxu0 %v1295_v8 }
  0x26   : > { %633 = vmatprep.subr.bf16.mxu0 %v1336_v1 }
  0x29   : > { %634 = vmatpush1.bf16.msra.mxu0 %v1296_v9 }
  0x2a   : > { %639 = vmatprep.subr.bf16.mxu0 %v1336_v1 }
  0x2d   : > { %640 = vmatpush2.bf16.msra.mxu0 %v617_v11 }
  0x2e   : > { %641 = vmatprep.subr.bf16.mxu0 %v1336_v1 }
  0x31   : > { %642 = vmatpush2.bf16.msra.mxu0 %v1298_v12 }
  0x32   : > { %643 = vmatprep.subr.bf16.mxu0 %v1336_v1 }
  0x35   : > { %644 = vmatpush2.bf16.msra.mxu0 %v1299_v13 }
  0x36   : > { %645 = vmatprep.subr.bf16.mxu0 %v1336_v1 }
  0x39   : > { %646 = vmatpush2.bf16.msra.mxu0 %v1300_v14 }
  0x3a   : > { %647 = vmatprep.subr.bf16.mxu0 %v1336_v1 }
  0x3d   : > { %648 = vmatpush2.bf16.msra.mxu0 %v1301_v15 }
  0x3e   : > { %649 = vmatprep.subr.bf16.mxu0 %v1336_v1 }
  0x41   : > { %650 = vmatpush2.bf16.msra.mxu0 %v1302_v16 }
  0x44   : > { %652 = vmatmul.mubr.bf16.vlgmr.msra.gmra.mxu0 %v1303_v17 }
  0x45   : > { %1198 = vmatprep.mubr.msk.bf16.mxu0 %vm602_vm0, %v1306_v18  ;;  %v778_v18 = vld [vmem:[%s1630_s5] sm:$0x3] }
  0x4c   : > { %660 = vmatmul.mubr.bf16.gmra.mxu0 %v1308_v19 }
  0x4d   : > { %1199 = vmatprep.mubr.msk.bf16.mxu0 %vm602_vm0, %v1309_v20 }
  0x54   : > { %668 = vmatmul.mubr.bf16.gmra.mxu0 %v1311_v21  ;;  %v786_v21 = vsel %vm784_vm4, %v778_v18, 0 }
  0x55   : > { %1200 = vmatprep.mubr.msk.bf16.mxu0 %vm602_vm0, %v1312_v22  ;;  %v720_v22 = vld [vmem:[%s1629_s4] sm:$0x1] }
  0x5c   : > { %676 = vmatmul.mubr.bf16.gmra.mxu0 %v1314_v23 }
 0x104   : > { %v653_v28 = vpop.f32.mrf.mxu0 }
 0x105   : > { %v1500_v37 = vadd.f32 %v1174_v33, %v653_v28 }
 0x106   : > { %v655_v29 = vpop.f32.mrf.mxu0 }
 0x107   : > { %v684_v43 = vmax.f32 %v1500_v37, 0.0 }
 0x108   : > { %v656_v30 = vpop.f32.mrf.mxu0 }
 0x109   : > { %v1498_v35 = vadd.f32 %v1174_v33, %v656_v30  ;;  %v693_v50 = vsel %vm692_vm3, %v684_v43, 0.0 }
 0x10a   : > { %v658_v31 = vpop.f32.mrf.mxu0 }
 0x10b   : > { %v685_v40 = vmax.f32 %v1498_v35, 0.0  ;;  %v1317_v31 = vld [vmem:[%s1632_s7 + $0x8] ss:$0 sps:$4 sm:$0xff]  }
 0x10c   : > { %v661_v32 = vpop.f32.mrf.mxu0 }
 0x10d   : > { %v1502_v38 = vadd.f32 %v1174_v33, %v661_v32  ;;  %v694_v47 = vsel %vm692_vm3, %v685_v40, 0.0  ;;  %v1318_v32 = vld [vmem:[%s1632_s7] sm:$0xff]  }
 0x10e   : > { %v663_v34 = vpop.f32.mrf.mxu0  ;;  %v695_v54 = vadd.f32 %v694_v47, %v693_v50 }
 0x10f   : > { %v686_v44 = vmax.f32 %v1502_v38, 0.0  ;;  %v779_v34 = vld [vmem:[%s1631_s6] sm:$0x1] }
 0x110   : > { %v664_v36 = vpop.f32.mrf.mxu0 }
 0x111   : > { %v1505_v41 = vadd.f32 %v1174_v33, %v664_v36  ;;  %v696_v51 = vsel %vm692_vm3, %v686_v44, 0.0 }
 0x112   : > { %v666_v39 = vpop.f32.mrf.mxu0  ;;  %v697_v58 = vadd.f32 %v696_v51, %v695_v54 }
 0x113   : > { %v687_v48 = vmax.f32 %v1505_v41, 0.0  ;;  %v1320_v41 = vld [vmem:[%s1449_s29] sm:$0xff]  }
 0x114   : > { %v669_v42 = vpop.f32.mrf.mxu0 }
 0x115   : > { %v1509_v45 = vadd.f32 %v1174_v33, %v669_v42  ;;  %v698_v56 = vsel %vm692_vm3, %v687_v48, 0.0 }
 0x116   : > { %v671_v46 = vpop.f32.mrf.mxu0  ;;  %v699_v62 = vadd.f32 %v698_v56, %v697_v58 }
 0x117   : > { %v688_v52 = vmax.f32 %v1509_v45, 0.0  ;;  %v1322_v45 = vld [vmem:[%s1449_s29 + $0x10] sm:$0xff]  }
 0x118   : > { %v672_v49 = vpop.f32.mrf.mxu0 }
 0x119   : > { %v1522_v53 = vadd.f32 %v1174_v33, %v672_v49  ;;  %v700_v60 = vsel %vm692_vm3, %v688_v52, 0.0 }
 0x11a   : > { %v674_v55 = vpop.f32.mrf.mxu0  ;;  %v701_v2 = vadd.f32 %v700_v60, %v699_v62 }
 0x11b   : > { %v689_v57 = vmax.f32 %v1522_v53, 0.0  ;;  %v834_v55 = vlaneseq }
 0x11c   : > { %v677_v59 = vpop.f32.mrf.mxu0 }
 0x11d   : > { %v1531_v61 = vadd.f32 %v1174_v33, %v677_v59  ;;  %v702_v0 = vsel %vm692_vm3, %v689_v57, 0.0  ;;  %v835_v56 = vshrl.u32 %v834_v55, 7 }
 0x11e   : > { %v679_v63 = vpop.f32.mrf.mxu0  ;;  %v703_v6 = vadd.f32 %v702_v0, %v701_v2 }
 0x11f   : > { %v690_v1 = vmax.f32 %v1531_v61, 0.0  ;;  %v836_v58 = vsub.s32 0, %v835_v56 }
 0x120   : > { %v680_v3 = vpop.f32.mrf.mxu0 }
 0x121   : > { %v704_v4 = vsel %vm692_vm3, %v690_v1, 0.0  ;;  %v1540_v5 = vadd.f32 %v1174_v33, %v680_v3  ;;  %v1319_v33 = vld [vmem:[%s1635_s10] sm:$0xff]  }
 0x122   : > { %v682_v7 = vpop.f32.mrf.mxu0  ;;  %v705_v9 = vadd.f32 %v704_v4, %v703_v6 }
 0x123   : > { %v691_v8 = vmax.f32 %v1540_v5, 0.0 }
 0x125   : > { %v706_v10 = vsel %vm692_vm3, %v691_v8, 0.0 }
 0x126   : > { %v707_v11 = vadd.f32 %v706_v10, %v705_v9  ;;  %v1212_v10 = vld [vmem:[%s1636_s11] ss:$0 sm:$0xff] }
 0x128   : > { %v708_v12 = vrot.slane %v707_v11, 4 }
 0x12a   : > { %v709_v13 = vadd.f32 %v708_v12, %v707_v11 }
 0x12c   : > { %v710_v14 = vrot.slane %v709_v13, 2 }
 0x12e   : > { %v711_v15 = vadd.f32 %v710_v14, %v709_v13 }
 0x130   : > { %v712_v16 = vrot.slane %v711_v15, 1 }
 0x132   : > { %v713_v17 = vadd.f32 %v712_v16, %v711_v15 }
 0x134   : > { %v715_v19 = vmul.f32 0.015625, %v713_v17 }
 0x136   : > { %v716_v20 = vpack.c.bf16 %v715_v19, %v715_v19 }
 0x138   : > { %1246 = vmatmul.mubr.msk.bf16.vlgmr.msra.gmra.mxu1 %vm692_vm3, %v716_v20 }
 0x139   : > { %1250 = vmatpush3.bf16.msra.mxu1 %v786_v21  ;;  %1251 = vmatprep.mubr.msk.bf16.mxu1 %vm1338_vm2, %v1337_v25  ;;  %v882_v25 = vsel %vm615_vm1, %v1317_v31, 0 }
 0x13a   : > { %1277 = vmatprep.subr.msk.bf16.mxu1 %vm615_vm1, %v1317_v31 }
 0x1f8   : > { %v770_v23 = vpop.f32.mrf.mxu1 }
 0x1f9   : > { %v771_v24 = vadd.f32 %v770_v23, %v720_v22 }
 0x1fa   : > { %v1247_v26 = vpop.f32.mrf.mxu1 }
 0x1fb   : > { %v776_v27 = vmax.f32 %v771_v24, 0.0 }
 0x1fc   : > { %v773_v28 = vpop.f32.mrf.mxu1 }
 0x1fd   : > { %v777_v29 = vpack.c.bf16 %v776_v27, %v776_v27 }
 0x1fe   : > { %v1248_v30 = vpop.f32.mrf.mxu1 }
 0x1ff   : > { %1252 = vmatmul.mubr.msk.bf16.vlgmr.msra.gmra.mxu1 %vm780_vm5, %v777_v29 }
 0x200   : > { %1256 = vmatpush3.bf16.msra.mxu1 %v882_v25 }
 0x201   : > { %1257 = vmatprep.subr.bf16.mxu1 %v1318_v32 }
 0x204   : > { %1258 = vmatpush3.bf16.msra.mxu1 %v1318_v32 }
 0x205   : > { %1267 = vmatprep.subr.bf16.mxu1 %v1319_v33 }
 0x2bf   : > { %v822_v36 = vpop.f32.mrf.mxu1 }
 0x2c0   : > { %v823_v39 = vadd.f32 %v822_v36, %v779_v34 }
 0x2c1   : > { %v1253_v42 = vpop.f32.mrf.mxu1 }
 0x2c2   : > { %v828_v46 = vsub.f32 0.0, %v823_v39 }
 0x2c3   : > { %v825_v47 = vpop.f32.mrf.mxu1 }
 0x2c4   : > { %v829_v49 = vmul.f32 1.442695, %v828_v46 }
 0x2c5   : > { %v1254_v50 = vpop.f32.mrf.mxu1 }
 0x2c6   : > { %1324 = vpow2.f32 %v829_v49 }
 0x2d3   : > { %v1325_v51 = vpop.eup %1324 }
 0x2d4   : > { %v831_v54 = vadd.f32 1.0, %v1325_v51 }
 0x2d6   : > { %1326 = vrcp.f32 %v831_v54 }
 0x2e3   : > { %v1327_v59 = vpop.eup %1326 }
 0x2e4   : > { %v837_v60 = vrot.slane %v1327_v59, %v836_v58 }
 0x2e6   : > { %v838_v62 = vmul.f32 %v837_v60, %v684_v43  ;;  %v839_v63 = vmul.f32 %v837_v60, %v685_v40  ;;  %v840_v0 = vmul.f32 %v837_v60, %v686_v44  ;;  %v841_v2 = vmul.f32 %v837_v60, %v687_v48  ;;  %v1321_v44 = vld [vmem:[%s1449_s29 + $0x8] sm:$0xff]   ;;  %v1323_v48 = vld [vmem:[%s1449_s29 + $0x18] sm:$0xff]  }
 0x2e7   : > { %v842_v3 = vmul.f32 %v837_v60, %v688_v52  ;;  %v843_v4 = vmul.f32 %v837_v60, %v689_v57  ;;  %v844_v38 = vmul.f32 %v837_v60, %v690_v1  ;;  %v845_v40 = vmul.f32 %v837_v60, %v691_v8  ;;  %v1205_v8 = vld [vmem:[%s1633_s8] ss:$0 sm:$0xff] }
 0x2e8   : > { %v846_v37 = vpack.c.bf16 %v839_v63, %v838_v62  ;;  %v847_v6 = vpack.c.bf16 %v841_v2, %v840_v0 }
 0x2e9   : > { %v848_v35 = vpack.c.bf16 %v843_v4, %v842_v3  ;;  %v849_v43 = vpack.c.bf16 %v845_v40, %v844_v38 }
 0x2ea   : > { %1259 = vmatprep.mubr.msk.bf16.mxu1 %vm692_vm3, %v846_v37 }
 0x2eb   : > { %1260 = vmatmul.mubr.msk.bf16.vlgmr.msra.gmra.mxu1 %vm692_vm3, %v847_v6 }
 0x2ec   : > { %1268 = vmatpush3.bf16.msra.mxu1 %v1319_v33  ;;  %1263 = vmatprep.mubr.msk.bf16.mxu1 %vm692_vm3, %v848_v35 }
 0x2f3   : > { %1264 = vmatmul.mubr.msk.bf16.gmra.mxu1 %vm692_vm3, %v849_v43 }
 0x2f4   : > { %1269 = vmatprep.mubr.msk.bf16.mxu1 %vm992_vm6, %v1320_v41 }
 0x2fb   : > { %1270 = vmatmul.mubr.msk.bf16.vlgmr.msra.gmra.mxu1 %vm992_vm6, %v1321_v44 }
 0x2fc   : > { %1273 = vmatprep.mubr.msk.bf16.mxu1 %vm992_vm6, %v1322_v45 }
 0x303   : > { %1274 = vmatmul.mubr.msk.bf16.gmra.mxu1 %vm992_vm6, %v1323_v48 }
 0x3ab   : > { %v1261_v52 = vpop.f32.mrf.mxu1 }
 0x3ac   : > { %v927_v12 = vadd.f32 %v1261_v52, %v1205_v8 }
 0x3ad   : > { %v918_v53 = vpop.f32.mrf.mxu1 }
 0x3ae   : > { %v919_v15 = vadd.f32 %v1205_v8, %v918_v53 }
 0x3af   : > { %v1262_v57 = vpop.f32.mrf.mxu1 }
 0x3b0   : > { %v930_v19 = vadd.f32 %v1262_v57, %v1205_v8 }
 0x3b1   : > { %v921_v61 = vpop.f32.mrf.mxu1 }
 0x3b2   : > { %v922_v24 = vadd.f32 %v1205_v8, %v921_v61 }
 0x3b3   : > { %v1265_v1 = vpop.f32.mrf.mxu1 }
 0x3b4   : > { %v943_v30 = vadd.f32 %v1265_v1, %v1205_v8 }
 0x3b5   : > { %v934_v5 = vpop.f32.mrf.mxu1 }
 0x3b6   : > { %v935_v34 = vadd.f32 %v1205_v8, %v934_v5 }
 0x3b7   : > { %v1266_v7 = vpop.f32.mrf.mxu1 }
 0x3b8   : > { %v946_v47 = vadd.f32 %v1266_v7, %v1205_v8 }
 0x3b9   : > { %v937_v9 = vpop.f32.mrf.mxu1 }
 0x3ba   : > { %v938_v55 = vadd.f32 %v1205_v8, %v937_v9 }
 0x3bb   : > { %v1271_v11 = vpop.f32.mrf.mxu1 }
 0x3bc   : > { %v1048_v13 = vadd.f32 %v1271_v11, %v1212_v10 }
 0x3bd   : > { %v1039_v14 = vpop.f32.mrf.mxu1 }
 0x3be   : > { %v1072_v16 = vadd.f32 %v1048_v13, %v927_v12  ;;  %v1040_v17 = vadd.f32 %v1212_v10, %v1039_v14 }
 0x3bf   : > { %v1272_v18 = vpop.f32.mrf.mxu1 }
 0x3c0   : > { %v1080_v20 = vmax.f32 %v1072_v16, 0.0  ;;  %v1070_v21 = vadd.f32 %v1040_v17, %v919_v15  ;;  %v1051_v22 = vadd.f32 %v1272_v18, %v1212_v10 }
 0x3c1   : > { %v1042_v23 = vpop.f32.mrf.mxu1 }
 0x3c2   : > { %1088 = vst.msk [vmem:[%s1604_s24 + $0x10] sm:$0xff] %vm692_vm3, %v1080_v20  ;;  %v1078_v26 = vmax.f32 %v1070_v21, 0.0  ;;  %v1073_v27 = vadd.f32 %v1051_v22, %v930_v19  ;;  %v1043_v28 = vadd.f32 %v1212_v10, %v1042_v23 }
 0x3c3   : > { %v1275_v29 = vpop.f32.mrf.mxu1 }
 0x3c4   : > { %1086 = vst.msk [vmem:[%s1604_s24] sm:$0xff] %vm692_vm3, %v1078_v26  ;;  %v1081_v31 = vmax.f32 %v1073_v27, 0.0  ;;  %v1071_v25 = vadd.f32 %v1043_v28, %v922_v24  ;;  %v1064_v32 = vadd.f32 %v1275_v29, %v1212_v10 }
 0x3c5   : > { %v1055_v33 = vpop.f32.mrf.mxu1 }
 0x3c6   : > { %1089 = vst.msk [vmem:[%s1604_s24 + $0x18] sm:$0xff] %vm692_vm3, %v1081_v31  ;;  %v1079_v36 = vmax.f32 %v1071_v25, 0.0  ;;  %v1076_v39 = vadd.f32 %v1064_v32, %v943_v30  ;;  %v1056_v42 = vadd.f32 %v1212_v10, %v1055_v33 }
 0x3c7   : > { %v1276_v46 = vpop.f32.mrf.mxu1 }
 0x3c8   : > { %1087 = vst.msk [vmem:[%s1604_s24 + $0x8] sm:$0xff] %vm692_vm3, %v1079_v36  ;;  %v1084_v49 = vmax.f32 %v1076_v39, 0.0  ;;  %v1074_v50 = vadd.f32 %v1056_v42, %v935_v34  ;;  %v1067_v51 = vadd.f32 %v1276_v46, %v1212_v10 }
 0x3c9   : > { %v1058_v54 = vpop.f32.mrf.mxu1 }
 0x3ca   : > { %1092 = vst.msk [vmem:[%s1604_s24 + $0x30] sm:$0xff] %vm692_vm3, %v1084_v49  ;;  %v1082_v56 = vmax.f32 %v1074_v50, 0.0  ;;  %v1077_v58 = vadd.f32 %v1067_v51, %v946_v47  ;;  %v1059_v59 = vadd.f32 %v1212_v10, %v1058_v54 }
 0x3cc   : > { %1090 = vst.msk [vmem:[%s1604_s24 + $0x20] sm:$0xff] %vm692_vm3, %v1082_v56  ;;  %v1085_v60 = vmax.f32 %v1077_v58, 0.0  ;;  %v1075_v62 = vadd.f32 %v1059_v59, %v938_v55 }
 0x3ce   : > { %1093 = vst.msk [vmem:[%s1604_s24 + $0x38] sm:$0xff] %vm692_vm3, %v1085_v60  ;;  %v1083_v63 = vmax.f32 %v1075_v62, 0.0 }
 0x3d0   : > { %1091 = vst.msk [vmem:[%s1604_s24 + $0x28] sm:$0xff] %vm692_vm3, %v1083_v63 }
 0x3d1 PF: > { %s22_s21 = sadd.s32 1, %s1334_s21  }
 0x3d2   : > { %p19_p4 = scmp.ge.s32.totalorder %s22_s21, 4  }
 0x3d4   :  { %21 = sbr.rel (!%p19_p4) target bundleno = 1 (0x1), region = 101 }

// kernel: _lambda_.11
= control target key start
LH: loop header
LB: loop body
LE: loop exit
PB: predicated region body
PF: predicated region fallthrough
CT: control target
= control target key end

     0   :  { %vm12_vm0 = vcmask 261120   ;;  %vm36_vm1 = vcmask 1041409   ;;  %vm39_vm2 = vcmask 254976   ;;  %vm45_vm3 = vcmask 1024   ;;  %s76_s0 = inlined_call_operand.vmem [shape: f32[2,16,32], index: 0, kind: input, shape index: {}]   ;;  %s77_s1 = inlined_call_operand.vmem [shape: f32[2,1], index: 1, kind: output, shape index: {}]  }
   0x1   :  { %v8_v0 = vld [vmem:[%s76_s0] sm:$0xff]  ;;  %v9_v1 = vld [vmem:[%s76_s0 + $0x8] sm:$0xff]  ;;  %v10_v2 = vld [vmem:[%s76_s0 + $0x10] sm:$0xff] }
   0x2   :  { %v11_v3 = vld [vmem:[%s76_s0 + $0x18] sm:$0xff]  ;;  %v13_v4 = vsel %vm12_vm0, %v8_v0, 0.0  ;;  %v14_v5 = vsel %vm12_vm0, %v9_v1, 0.0  ;;  %v22_v6 = vsel %vm12_vm0, %v10_v2, 0.0 }
   0x3   :  { %v15_v7 = vadd.f32 %v14_v5, %v13_v4  ;;  %v23_v8 = vsel %vm12_vm0, %v11_v3, 0.0 }
   0x4   :  { %v24_v9 = vadd.f32 %v23_v8, %v22_v6 }
   0x5   :  { %v16_v10 = vrot.slane %v15_v7, 4 }
   0x6   :  { %v25_v11 = vrot.slane %v24_v9, 4 }
   0x7   :  { %v17_v12 = vadd.f32 %v16_v10, %v15_v7 }
   0x8   :  { %v26_v13 = vadd.f32 %v25_v11, %v24_v9 }
   0x9   :  { %v18_v14 = vrot.slane %v17_v12, 2 }
   0xa   :  { %v27_v15 = vrot.slane %v26_v13, 2 }
   0xb   :  { %v19_v16 = vadd.f32 %v18_v14, %v17_v12 }
   0xc   :  { %v28_v17 = vadd.f32 %v27_v15, %v26_v13 }
   0xd   :  { %v20_v18 = vrot.slane %v19_v16, 1 }
   0xe   :  { %v29_v19 = vrot.slane %v28_v17, 1 }
   0xf   :  { %v21_v20 = vadd.f32 %v20_v18, %v19_v16 }
  0x10   :  { %v30_v21 = vadd.f32 %v29_v19, %v28_v17 }
  0x11   :  { %v32_v22 = vmul.f32 0.0625, %v21_v20 }
  0x12   :  { %v33_v23 = vmul.f32 0.0625, %v30_v21 }
  0x14   :  { %v37_v24 = vsel %vm36_vm1, %v33_v23, %v32_v22 }
  0x15   :  { %v40_v25 = vsel %vm39_vm2, %v37_v24, 0.0 }
  0x16   :  { %41 = vadd.xlane.f32.xlu0 %v40_v25 }
  0x9f   :  { %v42_v26 = vpop.xlane.xlu0 %41 }
  0xa0   :  { %v44_v27 = vmul.f32 0.03125, %v42_v26 }
  0xa2   :  { %46 = vst.msk [vmem:[%s77_s1] sm:$0x3] %vm45_vm3, %v44_v27 }

// kernel: _lambda_.10
= control target key start
LH: loop header
LB: loop body
LE: loop exit
PB: predicated region body
PF: predicated region fallthrough
CT: control target
= control target key end

     0   :  { %s1296_s21 = smov 0   ;;  %s1451_s0 = inlined_call_operand.vmem [shape: bf16[32,288], index: 0, kind: input, shape index: {}]   ;;  %s1452_s1 = inlined_call_operand.vmem [shape: bf16[288,32], index: 1, kind: input, shape index: {}]   ;;  %s1453_s2 = inlined_call_operand.vmem [shape: f32[1,32], index: 2, kind: input, shape index: {}]   ;;  %s1454_s3 = inlined_call_operand.vmem [shape: bf16[32,6], index: 3, kind: input, shape index: {}]   ;;  %s1455_s4 = inlined_call_operand.vmem [shape: f32[1,6], index: 4, kind: input, shape index: {}]   ;;  %s1456_s5 = inlined_call_operand.vmem [shape: bf16[6,32], index: 5, kind: input, shape index: {}]   ;;  %s1457_s6 = inlined_call_operand.vmem [shape: f32[1,32], index: 6, kind: input, shape index: {}]   ;;  %s1458_s7 = inlined_call_operand.vmem [shape: bf16[32,32], index: 7, kind: input, shape index: {}]   ;;  %s1459_s8 = inlined_call_operand.vmem [shape: f32[1,32], index: 8, kind: input, shape index: {}]   ;;  %s1460_s9 = inlined_call_operand.vmem [shape: bf16[32,24], index: 9, kind: input, shape index: {}]   ;;  %s1461_s10 = inlined_call_operand.vmem [shape: bf16[24,32], index: 10, kind: input, shape index: {}]   ;;  %s1462_s11 = inlined_call_operand.vmem [shape: f32[1,32], index: 11, kind: input, shape index: {}]   ;;  %s1463_s12 = inlined_call_operand.vmem [shape: f32[32,32], index: 12, kind: output, shape index: {}]  }
   0x1 LB: > { %s1054_s22 = sadd.s32 4294967295, %s1227_s21   ;;  %p1058_p0 = scmp.ge.s32.totalorder %s1227_s21, 1  ;;  %s1227_s21 = sphi %s1296_s21, %s22_s21  }
   0x2   : > { %p375_p1 = scmp.lt.s32.totalorder %s1227_s21, 3 }
   0x4   : > { %p376_p2 = pnand %p1058_p0, %p375_p1 }
   0x5   : > { %s1059_s27 = sshll.u32 (!%p376_p2), %s1054_s22, 1 }
   0x6   : > { %379 = sbr.rel (%p376_p2) target bundleno = 908 (0x38c), region = 68  ;;  %p424_p3 = scmp.lt.s32.totalorder (!%p376_p2), %s1059_s27, 3 }
   0xb   : > { %v1188_v0 = vld [vmem:[%s1452_s1 + $0x78] sm:$0xff]   ;;  %v1229_v2 = vmov 0.0   ;;  %v1190_v3 = vld [vmem:[%s1452_s1 + $0x70] sm:$0xff]   ;;  %v1192_v5 = vld [vmem:[%s1452_s1 + $0x68] sm:$0xff]   ;;  %vm1230_vm0 = vmmov 0   ;;  %s1465_s27 = smov (!%p424_p3, %s1059_s27), 3 }
   0xc   : > { %v1189_v1 = vld [vmem:[%s1452_s1 + $0x38] sm:$0xff]   ;;  %1139 = vmatprep.subr.bf16.mxu1 %v1229_v2  ;;  %1103 = vmatprep.subr.bf16.mxu0 %v1188_v0  ;;  %v1191_v4 = vld [vmem:[%s1452_s1 + $0x30] sm:$0xff]   ;;  %v1193_v6 = vld [vmem:[%s1452_s1 + $0x28] sm:$0xff]   ;;  %s1177_s25 = smul.u32 12, %s1465_s27  ;;  %vm613_vm1 = vcmask 261120   ;;  %vm781_vm2 = vcmask 1042432  }
   0xd   : > { %1104 = vmatpush3.bf16.msra.mxu0 %v1189_v1  ;;  %1143 = vmatprep.mubr.msk.bf16.mxu1 %vm1230_vm0, %v1229_v2  ;;  %v1194_v7 = vld [vmem:[%s1452_s1 + $0x60] sm:$0xff]   ;;  %v1196_v9 = vld [vmem:[%s1452_s1 + $0x58] sm:$0xff]   ;;  %v1202_v10 = vld [vmem:[%s1452_s1 + $0x88] sm:$0xff]   ;;  %vm777_vm3 = vcmask 48128   ;;  %vm935_vm4 = vcmask 1043456   ;;  %s1062_s30 = sshll.u32 %s1465_s27, 2 }
   0xe   : > { %1105 = vmatprep.subr.bf16.mxu0 %v1190_v3  ;;  %v1195_v8 = vld [vmem:[%s1452_s1 + $0x20] sm:$0xff]   ;;  %v1197_v11 = vld [vmem:[%s1452_s1 + $0x18] sm:$0xff]   ;;  %v1198_v12 = vld [vmem:[%s1452_s1 + $0x50] sm:$0xff]   ;;  %1140 = vmatpush3.bf16.msra.mxu1 %v1202_v10  ;;  %s428_s17 = scalar_lea.vmem %s1451_s0, %s1177_s25  ;;  %s434_s15 = scalar_lea.vmem %s1460_s9, %s1062_s30  ;;  %vm931_vm5 = vcmask 195584  }
   0xf   : > { %v1199_v13 = vld [vmem:[%s1452_s1 + $0x10] sm:$0xff]   ;;  %1141 = vmatprep.subr.bf16.mxu1 %v1229_v2  ;;  %v1205_v14 = vld [vmem:[%s1452_s1 + $0x80] sm:$0xff]   ;;  %v1200_v15 = vld [vmem:[%s1452_s1 + $0x48] sm:$0xff]   ;;  %s1064_s28 = sshll.u32 %s1465_s27, 3 }
  0x10   : > { %v1208_v16 = vld [vmem:[%s428_s17 + $0x4] ss:$12 sps:$4 sm:$0xff]   ;;  %v1209_v17 = vld [vmem:[%s428_s17 + $0x8] ss:$12 sps:$4 sm:$0xff]   ;;  %v1206_v21 = vld [vmem:[%s428_s17] ss:$12 sps:$4 sm:$0xff]   ;;  %s440_s13 = scalar_lea.vmem %s1463_s12, %s1064_s28 }
  0x11   : > { %1106 = vmatpush3.bf16.msra.mxu0 %v1191_v4  ;;  %v1201_v18 = vld [vmem:[%s1452_s1 + $0x8] sm:$0xff]   ;;  %649 = vmatprep.mubr.bf16.mxu0 %v1208_v16  ;;  %v1203_v19 = vld [vmem:[%s1452_s1 + $0x40] sm:$0xff]  }
  0x12   : > { %1107 = vmatprep.subr.bf16.mxu0 %v1192_v5  ;;  %1142 = vmatpush3.bf16.msra.mxu1 %v1205_v14  ;;  %v1204_v20 = vld [vmem:[%s1452_s1] sm:$0xff]   ;;  %v1210_v22 = vld [vmem:[%s1454_s3 + $0x8] sm:$0xff]  }
  0x13   : > { %1147 = vmatprep.subr.bf16.mxu1 %v1229_v2  ;;  %v1211_v23 = vld [vmem:[%s1454_s3] sm:$0xff]   ;;  %v1212_v62 = vld [vmem:[%s1461_s10 + $0x8] ss:$0 sps:$4 sm:$0xff]  }
  0x14   : > { %v1065_v29 = vld [vmem:[%s1453_s2] ss:$0 sm:$0xff]  ;;  %v1214_v63 = vld [vmem:[%s1458_s7 + $0x8] sm:$0xff]   ;;  %v937_v0 = vsel %vm935_vm4, %v1212_v62, 0 }
  0x15   : > { %1108 = vmatpush3.bf16.msra.mxu0 %v1193_v6  ;;  %1144 = vmatmul.mubr.msk.bf16.vlgmr.msra.gmra.mxu1 %vm613_vm1, %v1209_v17  ;;  %v775_v50 = vld [vmem:[%s1456_s5] sm:$0x7] }
  0x16   : > { %1109 = vmatprep.subr.bf16.mxu0 %v1194_v7  ;;  %1151 = vmatprep.mubr.msk.bf16.mxu1 %vm1230_vm0, %v1229_v2  ;;  %v783_v53 = vsel %vm781_vm2, %v775_v50, 0  ;;  %v717_v54 = vld [vmem:[%s1455_s4] sm:$0x1] }
  0x17   : > { %1148 = vmatpush3.bf16.msra.mxu1 %v1210_v22  ;;  %v1216_v1 = vld [vmem:[%s1458_s7] sm:$0xff]  }
  0x18   : > { %1149 = vmatprep.subr.bf16.mxu1 %v1229_v2  ;;  %v1213_v3 = vld [vmem:[%s1461_s10] sm:$0xff]  }
  0x19   : > { %1110 = vmatpush3.bf16.msra.mxu0 %v1195_v8  ;;  %v1215_v4 = vld [vmem:[%s434_s15] sm:$0xff]  }
  0x1a   : > { %1111 = vmatprep.subr.bf16.mxu0 %v1196_v9  ;;  %v776_v5 = vld [vmem:[%s1457_s6] sm:$0x1] }
  0x1b   : > { %1150 = vmatpush3.bf16.msra.mxu1 %v1211_v23 }
  0x1c   : > { %1155 = vmatprep.subr.bf16.mxu1 %v1229_v2 }
  0x1d   : > { %1112 = vmatpush3.bf16.msra.mxu0 %v1197_v11 }
  0x1e   : > { %1113 = vmatprep.subr.bf16.mxu0 %v1198_v12 }
  0x21   : > { %1114 = vmatpush3.bf16.msra.mxu0 %v1199_v13 }
  0x22   : > { %1115 = vmatprep.subr.bf16.mxu0 %v1200_v15 }
  0x25   : > { %1116 = vmatpush3.bf16.msra.mxu0 %v1201_v18 }
  0x26   : > { %1117 = vmatprep.subr.bf16.mxu0 %v1203_v19 }
  0x29   : > { %1118 = vmatpush3.bf16.msra.mxu0 %v1204_v20 }
  0x2a   : > { %1169 = vmatprep.subr.bf16.mxu0 %v1229_v2 }
  0x2c   : > { %650 = vmatmul.mubr.bf16.vlgmr.msra.gmra.mxu0 %v1206_v21 }
  0x2d   : > { %1173 = vmatprep.mubr.msk.bf16.mxu0 %vm1230_vm0, %v1229_v2  ;;  %1170 = vmatpush3.bf16.msra.mxu0 %v937_v0 }
  0x2e   : > { %1171 = vmatprep.subr.bf16.mxu0 %v1229_v2 }
  0x31   : > { %1172 = vmatpush3.bf16.msra.mxu0 %v1213_v3 }
  0x34   : > { %1174 = vmatmul.mubr.msk.bf16.vlgmr.msra.gmra.mxu0 %vm931_vm5, %v1215_v4 }
  0xd5   : > { %v692_v24 = vpop.f32.mrf.mxu1 }
  0xd7   : > { %v1145_v25 = vpop.f32.mrf.mxu1 }
  0xd9   : > { %v695_v26 = vpop.f32.mrf.mxu1 }
  0xdb   : > { %v1146_v27 = vpop.f32.mrf.mxu1 }
  0xdc   : > { %v1092_v27 = vld [vmem:[%s1459_s8] ss:$0 sm:$0xff] }
  0xec   : > { %v1119_v28 = vpop.f32.mrf.mxu0 }
  0xee   : > { %v1120_v30 = vpop.f32.mrf.mxu0 }
  0xef   : > { %v1121_v31 = vadd.f32 %v1120_v30, %v1119_v28 }
  0xf0   : > { %v1122_v32 = vpop.f32.mrf.mxu0 }
  0xf1   : > { %v652_v33 = vadd.f32 %v1121_v31, %v1065_v29 }
  0xf2   : > { %v1123_v34 = vpop.f32.mrf.mxu0 }
  0xf3   : > { %v1386_v35 = vadd.f32 %v692_v24, %v652_v33  ;;  %v1124_v36 = vadd.f32 %v1123_v34, %v1122_v32 }
  0xf4   : > { %v973_v22 = vpop.f32.mrf.mxu0 }
  0xf5   : > { %v655_v37 = vadd.f32 %v1124_v36, %v1065_v29  ;;  %v699_v38 = vmax.f32 %v1386_v35, 0.0 }
  0xf6   : > { %v1175_v23 = vpop.f32.mrf.mxu0 }
  0xf7   : > { %v1389_v39 = vadd.f32 %v695_v26, %v655_v37  ;;  %v701_v41 = vsel %vm613_vm1, %v699_v38, 0.0  ;;  %v1096_v26 = vld [vmem:[%s1462_s11] ss:$0 sm:$0xff] }
  0xf8   : > { %v976_v24 = vpop.f32.mrf.mxu0  ;;  %v974_v28 = vadd.f32 %v1096_v26, %v973_v22 }
  0xf9   : > { %v700_v40 = vmax.f32 %v1389_v39, 0.0  ;;  %v977_v34 = vadd.f32 %v1096_v26, %v976_v24 }
  0xfa   : > { %v1176_v25 = vpop.f32.mrf.mxu0 }
  0xfb   : > { %v702_v42 = vsel %vm613_vm1, %v700_v40, 0.0 }
  0xfc   : > { %v703_v43 = vadd.f32 %v702_v42, %v701_v41 }
  0xfe   : > { %v704_v44 = vrot.slane %v703_v43, 4 }
 0x100   : > { %v705_v45 = vadd.f32 %v704_v44, %v703_v43 }
 0x102   : > { %v706_v46 = vrot.slane %v705_v45, 2 }
 0x104   : > { %v707_v47 = vadd.f32 %v706_v46, %v705_v45 }
 0x106   : > { %v708_v48 = vrot.slane %v707_v47, 1 }
 0x108   : > { %v709_v49 = vadd.f32 %v708_v48, %v707_v47 }
 0x10a   : > { %v711_v51 = vmul.f32 0.0625, %v709_v49 }
 0x10c   : > { %v712_v52 = vpack.c.bf16 %v711_v51, %v711_v51 }
 0x10e   : > { %1152 = vmatmul.mubr.msk.bf16.vlgmr.msra.gmra.mxu1 %vm613_vm1, %v712_v52 }
 0x10f   : > { %1156 = vmatpush3.bf16.msra.mxu1 %v783_v53  ;;  %1157 = vmatprep.mubr.msk.bf16.mxu1 %vm1230_vm0, %v1229_v2 }
 0x110   : > { %1161 = vmatprep.subr.bf16.mxu1 %v1229_v2 }
 0x1ce   : > { %v767_v55 = vpop.f32.mrf.mxu1 }
 0x1cf   : > { %v768_v56 = vadd.f32 %v767_v55, %v717_v54 }
 0x1d0   : > { %v1153_v57 = vpop.f32.mrf.mxu1 }
 0x1d1   : > { %v773_v58 = vmax.f32 %v768_v56, 0.0 }
 0x1d2   : > { %v770_v59 = vpop.f32.mrf.mxu1 }
 0x1d3   : > { %v774_v60 = vpack.c.bf16 %v773_v58, %v773_v58 }
 0x1d4   : > { %v1154_v61 = vpop.f32.mrf.mxu1 }
 0x1d5   : > { %1158 = vmatmul.mubr.msk.bf16.vlgmr.msra.gmra.mxu1 %vm777_vm3, %v774_v60 }
 0x1d6   : > { %1165 = vmatprep.mubr.msk.bf16.mxu1 %vm1230_vm0, %v1229_v2  ;;  %1162 = vmatpush3.bf16.msra.mxu1 %v1214_v63 }
 0x1d7   : > { %1163 = vmatprep.subr.bf16.mxu1 %v1229_v2  ;;  %v831_v2 = vlaneseq }
 0x1d9   : > { %v832_v15 = vshrl.u32 %v831_v2, 7 }
 0x1da   : > { %1164 = vmatpush3.bf16.msra.mxu1 %v1216_v1 }
 0x1db   : > { %v833_v16 = vsub.s32 0, %v832_v15 }
 0x295   : > { %v819_v6 = vpop.f32.mrf.mxu1 }
 0x296   : > { %v820_v7 = vadd.f32 %v819_v6, %v776_v5 }
 0x297   : > { %v1159_v8 = vpop.f32.mrf.mxu1 }
 0x298   : > { %v825_v9 = vsub.f32 0.0, %v820_v7 }
 0x299   : > { %v822_v10 = vpop.f32.mrf.mxu1 }
 0x29a   : > { %v826_v11 = vmul.f32 1.442695, %v825_v9 }
 0x29b   : > { %v1160_v12 = vpop.f32.mrf.mxu1 }
 0x29c   : > { %1217 = vpow2.f32 %v826_v11 }
 0x2a9   : > { %v1218_v13 = vpop.eup %1217 }
 0x2aa   : > { %v828_v14 = vadd.f32 1.0, %v1218_v13 }
 0x2ac   : > { %1219 = vrcp.f32 %v828_v14 }
 0x2b9   : > { %v1220_v17 = vpop.eup %1219 }
 0x2ba   : > { %v834_v18 = vrot.slane %v1220_v17, %v833_v16 }
 0x2bc   : > { %v835_v19 = vmul.f32 %v834_v18, %v699_v38  ;;  %v836_v20 = vmul.f32 %v834_v18, %v700_v40 }
 0x2be   : > { %v837_v21 = vpack.c.bf16 %v836_v20, %v835_v19 }
 0x2c0   : > { %1166 = vmatmul.mubr.msk.bf16.vlgmr.msra.gmra.mxu1 %vm613_vm1, %v837_v21 }
 0x380   : > { %v898_v29 = vpop.f32.mrf.mxu1 }
 0x381   : > { %v899_v30 = vadd.f32 %v1092_v27, %v898_v29 }
 0x382   : > { %v1167_v31 = vpop.f32.mrf.mxu1 }
 0x383   : > { %v980_v32 = vadd.f32 %v974_v28, %v899_v30 }
 0x384   : > { %v901_v33 = vpop.f32.mrf.mxu1 }
 0x385   : > { %v982_v35 = vmax.f32 %v980_v32, 0.0  ;;  %v902_v36 = vadd.f32 %v1092_v27, %v901_v33 }
 0x386   : > { %v1168_v37 = vpop.f32.mrf.mxu1 }
 0x387   : > { %984 = vst.msk [vmem:[%s440_s13] sm:$0xff] %vm613_vm1, %v982_v35  ;;  %v981_v38 = vadd.f32 %v977_v34, %v902_v36 }
 0x389   : > { %v983_v39 = vmax.f32 %v981_v38, 0.0 }
 0x38b   : > { %985 = vst.msk [vmem:[%s440_s13 + $0x8] sm:$0xff] %vm613_vm1, %v983_v39 }
 0x38c PF: > { %s22_s21 = sadd.s32 1, %s1227_s21  }
 0x38d   : > { %p19_p4 = scmp.ge.s32.totalorder %s22_s21, 4  }
 0x38f   :  { %21 = sbr.rel (!%p19_p4) target bundleno = 1 (0x1), region = 101 }

</bundles_post_ra>
